<compile_context>
chip_gen: v5e
topology: v5e:2x2
jax: 0.10.0
libtpu: 0.0.40
codegen_flags: <defaults>
</compile_context>

<pallas_src>
import functools

import jax
import jax.numpy as jnp
from jax.experimental import pallas as pl
from jax.experimental.pallas import tpu as pltpu


# Rows of the packed bias tile (each row zero-padded to 128 lanes, f32).
(_B_CONV_M, _B_CONV_A, _B_API_SC, _B_TAG, _B_SC,
 _B_FIC, _B_F, _B_YZ, _B_Q) = range(9)
_BIAS_ROWS = 9
_BIAS_LANES = 128


# ----------------------------------------------------------------------------
# Fused forward kernel (no grid: the whole problem fits in VMEM).
# ----------------------------------------------------------------------------
def _fused_mtfmpp_kernel(dims,
                         cols_m_ref, cols_a_ref,
                         w_conv_m_ref, w_conv_a_ref,
                         tag_ref, qual_t_ref, w_q_t_ref,
                         w_api_sc_ref, w_tag_ref, w_sc_ref, w_fic_ref,
                         w_f1_ref, w_f2_ref, w_f3_ref, w_yz_ref,
                         bias_ref,
                         yz_ref):
    (B, A, L, K, kernel_sizes, F, num_cat) = dims
    n_ks = len(kernel_sizes)
    C = n_ks * K
    f32 = jnp.float32
    bf16 = jnp.bfloat16

    bias_all = bias_ref[...]                                   # (9, 128) f32

    def bias(row, width):
        return bias_all[row:row + 1, :width]                   # (1, width) f32

    def dot(a, b):                                             # MXU: bf16 in, f32 acc
        return jnp.dot(a.astype(bf16), b, preferred_element_type=f32)

    # Valid conv-window mask (shared by both banks): position l inside a doc is
    # a valid window start for kernel-size block hi iff l <= L - h_hi.
    pos = jax.lax.broadcasted_iota(jnp.int32, (L, C), 0)
    col = jax.lax.broadcasted_iota(jnp.int32, (L, C), 1)
    lout_col = jnp.full((L, C), L - kernel_sizes[0] + 1, jnp.int32)
    for hi in range(1, n_ks):
        in_block = (col >= hi * K) & (col < (hi + 1) * K)
        lout_col = jnp.where(in_block, L - kernel_sizes[hi] + 1, lout_col)
    valid2 = pos < lout_col                                    # (L, C)
    valid3 = valid2[None]                                      # (1, L, C)

    def conv_bank(cols_ref, n_docs, w_ref, b_row):
        # One deep matmul for all docs / all kernel sizes of this bank.
        acc = jnp.dot(cols_ref[...], w_ref[...],
                      preferred_element_type=f32)              # (n_docs*L, C)
        if L % 8 == 0:
            acc3 = acc.reshape(n_docs, L, C)
            acc3 = jnp.where(valid3, acc3, -1e30)
            pooled = jnp.max(acc3, axis=1)                     # (n_docs, C)
        else:
            # fallback: unrolled per-doc pooling (matmul above stays batched)
            rows = [jnp.max(jnp.where(valid2, acc[n * L:(n + 1) * L, :], -1e30),
                            axis=0, keepdims=True) for n in range(n_docs)]
            pooled = jnp.concatenate(rows, axis=0)
        # bias + ReLU folded into the max-pool epilogue (monotone).
        return jnp.maximum(pooled + bias(b_row, C), 0.0)

    e_m = conv_bank(cols_m_ref, B, w_conv_m_ref, _B_CONV_M)    # (B, C)
    e_api = conv_bank(cols_a_ref, A, w_conv_a_ref, _B_CONV_A)  # (A, C)

    # ----- API branch (batch independent; cacheable for a static API set) -----
    api_sc = jnp.tanh(dot(e_api, w_api_sc_ref[...]) + bias(_B_API_SC, F))    # (A, F)
    api_tag = jnp.tanh(dot(tag_ref[...], w_tag_ref[...]) + bias(_B_TAG, F))  # (A, F)
    m_mat = jnp.tanh(api_sc + api_tag)                         # (A, F); torch stores (F, A)

    # api_quality_layer as a VPU multiply-reduce (avoids an M=1 MXU pass)
    q_row = jnp.tanh(jnp.sum(w_q_t_ref[...] * qual_t_ref[...],
                             axis=0, keepdims=True) + bias(_B_Q, 1))         # (1, A)
    qb = dot(q_row, w_f3_ref[...]) + bias(_B_F, A)             # (1, A) quality + fusion bias

    # ----- mashup branch -----
    u_sc = dot(e_m, w_sc_ref[...]) + bias(_B_SC, A)                          # (B, A)
    u_sc_trans = jnp.tanh(dot(e_m, w_fic_ref[...]) + bias(_B_FIC, F))        # (B, F)
    # u_mm = u_sc_trans @ tanh(api_sc^T + api_tag^T)  (contract the F axis)
    u_fic = jnp.tanh(jnp.einsum('bf,af->ba', u_sc_trans, m_mat,
                                preferred_element_type=f32))                 # (B, A)

    # fusion_layer(cat((u_sc, u_fic, q), dim=1)) with split weights.
    # dropout: identity at inference.
    u_mmf = dot(u_sc, w_f1_ref[...]) + dot(u_fic, w_f2_ref[...]) + qb        # (B, A)

    # merged task heads: single matmul + sigmoid, one lane-dense store
    yz_ref[...] = jax.nn.sigmoid(dot(u_mmf, w_yz_ref[...])
                                 + bias(_B_YZ, A + num_cat))                 # (B, A+C)


# ----------------------------------------------------------------------------
# Wrapper: embedding gather in im2col layout + the single pallas_call.
# ----------------------------------------------------------------------------
def _im2col_indices(tokens, h_max, pad_id):
    """(N, L) int32 -> (N*L, h_max) token indices; window rows whose tail crosses
    a document boundary are discarded by the in-kernel valid-position mask."""
    N, L = tokens.shape
    T = N * L
    flat = jnp.concatenate([tokens.reshape(-1),
                            jnp.full((h_max - 1,), pad_id, tokens.dtype)])
    return jnp.stack([flat[j:j + T] for j in range(h_max)], axis=1)


def mtfmpp_forward(config, params, mashup_des, api_des):
    K = config['num_kernel']
    kernel_sizes = tuple(config['kernel_sizes'])
    h_max = max(kernel_sizes)
    n_ks = len(kernel_sizes)

    B, L = mashup_des.shape
    A = api_des.shape[0]
    embed = params['embed']                      # (V, D) bf16, padding row zeroed
    V, D = embed.shape
    F = params['w_api_sc'].shape[1]
    num_cat = params['tag_embed'].shape[1]
    C = n_ks * K
    pad_id = V - 1

    # Gather embeddings directly into im2col rows: (N*L, h_max*D)
    idx_m = _im2col_indices(mashup_des, h_max, pad_id)
    idx_a = _im2col_indices(api_des, h_max, pad_id)
    cols_m = jnp.take(embed, idx_m.reshape(-1), axis=0).reshape(B * L, h_max * D)
    cols_a = jnp.take(embed, idx_a.reshape(-1), axis=0).reshape(A * L, h_max * D)

    args = (cols_m, cols_a,
            params['w_conv_m'], params['w_conv_a'],
            params['tag_embed'], params['qual_embed_t'], params['w_q_t'],
            params['w_api_sc'], params['w_tag'], params['w_sc'], params['w_fic'],
            params['w_f1'], params['w_f2'], params['w_f3'], params['w_yz'],
            params['bias_pack'])

    # Advisory cost estimate so XLA schedules the gathers around the fused call.
    flops = 2 * ((B + A) * L * (h_max * D) * C
                 + A * C * F + A * num_cat * F
                 + B * C * (A + F) + B * F * A
                 + A * A + 2 * B * A * A + B * A * (A + num_cat) + 13 * A)
    transcend = 3 * A * F + B * (F + 2 * A + num_cat) + A
    bytes_acc = sum(x.size * x.dtype.itemsize for x in args) + B * (A + num_cat) * 4

    yz = pl.pallas_call(
        functools.partial(_fused_mtfmpp_kernel,
                          (B, A, L, K, kernel_sizes, F, num_cat)),
        out_shape=jax.ShapeDtypeStruct((B, A + num_cat), jnp.float32),
        cost_estimate=pl.CostEstimate(flops=flops, transcendentals=transcend,
                                      bytes_accessed=bytes_acc),
    )(*args)
    return yz[:, :A], yz[:, A:]


# ----------------------------------------------------------------------------
# Deterministic synthetic parameter init (torch layouts repacked for the kernel).
# ----------------------------------------------------------------------------
def init_params(key, *, vocab_size, embed_dim, max_doc_len, num_kernel,
                kernel_sizes, feature_dim, num_api, num_category):
    del max_doc_len
    n_ks = len(kernel_sizes)
    h_max = max(kernel_sizes)
    C = num_kernel * n_ks
    bf16 = jnp.bfloat16

    ks = jax.random.split(key, 64)
    it = iter(range(64))
    nxt = lambda: ks[next(it)]
    rnd = lambda shape, scale=0.1: (scale * jax.random.normal(nxt(), shape)
                                    ).astype(jnp.float32)

    # embedding table, padding_idx row zeroed
    embed = rnd((vocab_size, embed_dim)).at[vocab_size - 1].set(0.0)

    # conv banks: per-tap torch layout (h, D, K) assembled into one im2col weight
    # (h_max*D, n_ks*K); taps beyond a block's kernel size stay zero.
    def conv_bank(ws, bs):
        W = jnp.zeros((h_max * embed_dim, C), jnp.float32)
        for hi, w in enumerate(ws):
            h = w.shape[0]
            W = W.at[:h * embed_dim, hi * num_kernel:(hi + 1) * num_kernel].set(
                w.reshape(h * embed_dim, num_kernel))
        b = jnp.concatenate([bb.reshape(-1) for bb in bs])
        return W.astype(bf16), b

    m_ws = [rnd((h, embed_dim, num_kernel)) for h in kernel_sizes]
    m_bs = [rnd((1, num_kernel)) for _ in kernel_sizes]
    a_ws = [rnd((h, embed_dim, num_kernel)) for h in kernel_sizes]
    a_bs = [rnd((1, num_kernel)) for _ in kernel_sizes]
    w_conv_m, b_conv_m = conv_bank(m_ws, m_bs)
    w_conv_a, b_conv_a = conv_bank(a_ws, a_bs)

    # torch flattens pooled features K-major (cat(dim=2).view); the kernel emits
    # kernel-size-major blocks, so permute the rows of the consuming Linears.
    perm = jnp.array([(c % num_kernel) * n_ks + (c // num_kernel)
                      for c in range(C)], jnp.int32)
    permute = lambda w: jnp.take(w, perm, axis=0)

    # Linear layers stored (in, out)
    w_api_sc = permute(rnd((C, feature_dim)));   b_api_sc = rnd((feature_dim,))
    w_tag = rnd((num_category, feature_dim));    b_tag = rnd((feature_dim,))
    w_sc = permute(rnd((C, num_api)));           b_sc = rnd((num_api,))
    w_fic = permute(rnd((C, feature_dim)));      b_fic = rnd((feature_dim,))
    w_q_t = rnd((1, 13)).T;                      b_q = rnd((1,))
    w_f1 = rnd((num_api, num_api))
    w_f2 = rnd((num_api, num_api))
    w_f3 = rnd((num_api, num_api));              b_f = rnd((num_api,))
    w_y = rnd((num_api, num_api));               b_y = rnd((num_api,))
    w_z = rnd((num_api, num_category));          b_z = rnd((num_category,))

    # single packed bias tile (one (9,128) VMEM tile instead of ~10 tiny DMAs)
    def pad_row(v):
        assert v.shape[0] <= _BIAS_LANES
        return jnp.pad(v, (0, _BIAS_LANES - v.shape[0]))

    bias_pack = jnp.stack([
        pad_row(b_conv_m), pad_row(b_conv_a), pad_row(b_api_sc), pad_row(b_tag),
        pad_row(b_sc), pad_row(b_fic), pad_row(b_f),
        pad_row(jnp.concatenate([b_y, b_z])), pad_row(b_q)])   # (9, 128) f32

    params = {
        'embed': embed.astype(bf16),
        'tag_embed': rnd((num_api, num_category)).astype(bf16),   # api_tag_embed.weight
        'qual_embed_t': rnd((num_api, 13)).T,                     # quality embed^T (f32, VPU)
        'w_q_t': w_q_t,                                           # (13, 1) f32
        'w_conv_m': w_conv_m, 'w_conv_a': w_conv_a,
        'w_api_sc': w_api_sc.astype(bf16), 'w_tag': w_tag.astype(bf16),
        'w_sc': w_sc.astype(bf16), 'w_fic': w_fic.astype(bf16),
        'w_f1': w_f1.astype(bf16), 'w_f2': w_f2.astype(bf16),
        'w_f3': w_f3.astype(bf16),
        'w_yz': jnp.concatenate([w_y, w_z], axis=1).astype(bf16), # merged task heads
        'bias_pack': bias_pack,
    }
    # TODO(synk): fic_fcl Linear is defined in __init__ but unused in forward; omitted.
    return params


if __name__ == "__main__":
    # small config consistent with the module's forward
    vocab_size = 50
    embed_dim = 32
    max_doc_len = 16
    num_kernel = 16
    kernel_sizes = (2, 3, 4)
    feature_dim = 32
    num_api = 24
    num_category = 8
    batch = 2

    key = jax.random.PRNGKey(0)
    kp, km, ka = jax.random.split(key, 3)

    params = init_params(kp, vocab_size=vocab_size, embed_dim=embed_dim,
                         max_doc_len=max_doc_len, num_kernel=num_kernel,
                         kernel_sizes=kernel_sizes, feature_dim=feature_dim,
                         num_api=num_api, num_category=num_category)

    mashup_des = jax.random.randint(km, (batch, max_doc_len), 0, vocab_size,
                                    dtype=jnp.int32)
    api_des = jax.random.randint(ka, (num_api, max_doc_len), 0, vocab_size,
                                 dtype=jnp.int32)

    config = {'num_kernel': num_kernel, 'kernel_sizes': kernel_sizes}
    fwd = jax.jit(functools.partial(mtfmpp_forward, config))

    y_m, z_m = fwd(params, mashup_des, api_des)
    jax.block_until_ready((y_m, z_m))

    assert y_m.shape == (batch, num_api) and z_m.shape == (batch, num_category)
    assert bool(jnp.all(jnp.isfinite(y_m))) and bool(jnp.all(jnp.isfinite(z_m)))
    print("KERNEL_OK")
</pallas_src>

<mosaic_0001>
module attributes {stable_mosaic.version = 11 : i64} {
  func.func @_fused_mtfmpp_kernel(%arg0: memref<32x128xbf16, #tpu.memory_space<vmem>>, %arg1: memref<384x128xbf16, #tpu.memory_space<vmem>>, %arg2: memref<128x48xbf16, #tpu.memory_space<vmem>>, %arg3: memref<128x48xbf16, #tpu.memory_space<vmem>>, %arg4: memref<24x8xbf16, #tpu.memory_space<vmem>>, %arg5: memref<13x24xf32, #tpu.memory_space<vmem>>, %arg6: memref<13x1xf32, #tpu.memory_space<vmem>>, %arg7: memref<48x32xbf16, #tpu.memory_space<vmem>>, %arg8: memref<8x32xbf16, #tpu.memory_space<vmem>>, %arg9: memref<48x24xbf16, #tpu.memory_space<vmem>>, %arg10: memref<48x32xbf16, #tpu.memory_space<vmem>>, %arg11: memref<24x24xbf16, #tpu.memory_space<vmem>>, %arg12: memref<24x24xbf16, #tpu.memory_space<vmem>>, %arg13: memref<24x24xbf16, #tpu.memory_space<vmem>>, %arg14: memref<24x32xbf16, #tpu.memory_space<vmem>>, %arg15: memref<9x128xf32, #tpu.memory_space<vmem>>, %arg16: memref<2x32xf32, #tpu.memory_space<vmem>>) attributes {dimension_semantics = [], scalar_prefetch = 0 : i64, scratch_operands = 0 : i64, tpu.core_type = #tpu.core_type<tc>} {
    %c0 = arith.constant 0 : index
    %c0_0 = arith.constant 0 : index
    %0 = vector.load %arg15[%c0, %c0_0] : memref<9x128xf32, #tpu.memory_space<vmem>>, vector<9x128xf32>
    %1 = tpu.iota {dimensions = array<i32: 0>} : vector<16x48xi32>
    %2 = tpu.iota {dimensions = array<i32: 1>} : vector<16x48xi32>
    %c15_i32 = arith.constant 15 : i32
    %3 = vector.broadcast %c15_i32 : i32 to vector<16x48xi32>
    %c16_i32 = arith.constant 16 : i32
    %4 = vector.broadcast %c16_i32 : i32 to vector<16x48xi32>
    %5 = arith.cmpi sge, %2, %4 : vector<16x48xi32>
    %c32_i32 = arith.constant 32 : i32
    %6 = vector.broadcast %c32_i32 : i32 to vector<16x48xi32>
    %7 = arith.cmpi slt, %2, %6 : vector<16x48xi32>
    %8 = arith.andi %5, %7 : vector<16x48xi1>
    %c14_i32 = arith.constant 14 : i32
    %9 = vector.broadcast %c14_i32 : i32 to vector<16x48xi32>
    %10 = arith.select %8, %9, %3 : vector<16x48xi1>, vector<16x48xi32>
    %c32_i32_1 = arith.constant 32 : i32
    %11 = vector.broadcast %c32_i32_1 : i32 to vector<16x48xi32>
    %12 = arith.cmpi sge, %2, %11 : vector<16x48xi32>
    %c48_i32 = arith.constant 48 : i32
    %13 = vector.broadcast %c48_i32 : i32 to vector<16x48xi32>
    %14 = arith.cmpi slt, %2, %13 : vector<16x48xi32>
    %15 = arith.andi %12, %14 : vector<16x48xi1>
    %c13_i32 = arith.constant 13 : i32
    %16 = vector.broadcast %c13_i32 : i32 to vector<16x48xi32>
    %17 = arith.select %15, %16, %10 : vector<16x48xi1>, vector<16x48xi32>
    %18 = arith.cmpi slt, %1, %17 : vector<16x48xi32>
    %19 = vector.shape_cast %18 : vector<16x48xi1> to vector<1x16x48xi1>
    %c0_2 = arith.constant 0 : index
    %c0_3 = arith.constant 0 : index
    %20 = vector.load %arg0[%c0_2, %c0_3] : memref<32x128xbf16, #tpu.memory_space<vmem>>, vector<32x128xbf16>
    %c0_4 = arith.constant 0 : index
    %c0_5 = arith.constant 0 : index
    %21 = vector.load %arg2[%c0_4, %c0_5] : memref<128x48xbf16, #tpu.memory_space<vmem>>, vector<128x48xbf16>
    %cst = arith.constant dense<0.000000e+00> : vector<32x48xf32>
    %22 = tpu.matmul %20, %21, %cst {dimension_numbers = #tpu.dot_dimension_numbers<[1], [0], [0], [1], [0, 0, 1, 1], [], []>} : vector<32x128xbf16>, vector<128x48xbf16>, vector<32x48xf32> -> vector<32x48xf32>
    %23 = vector.shape_cast %22 : vector<32x48xf32> to vector<2x16x48xf32>
    %cst_6 = arith.constant -1.000000e+30 : f32
    %24 = vector.shape_cast %19 : vector<1x16x48xi1> to vector<1x16x48xi1>
    %25 = vector.broadcast %24 : vector<1x16x48xi1> to vector<2x16x48xi1>
    %26 = vector.broadcast %cst_6 : f32 to vector<2x16x48xf32>
    %27 = arith.select %25, %23, %26 : vector<2x16x48xi1>, vector<2x16x48xf32>
    %cst_7 = arith.constant dense<0xFF800000> : vector<2x48xf32>
    %28 = vector.multi_reduction <maximumf>, %27, %cst_7 [1] : vector<2x16x48xf32> to vector<2x48xf32>
    %29 = vector.extract_strided_slice %0 {offsets = [0, 0], sizes = [1, 48], strides = [1, 1]} : vector<9x128xf32> to vector<1x48xf32>
    %30 = vector.broadcast %29 : vector<1x48xf32> to vector<2x48xf32>
    %31 = arith.addf %28, %30 : vector<2x48xf32>
    %cst_8 = arith.constant 0.000000e+00 : f32
    %32 = vector.broadcast %cst_8 : f32 to vector<2x48xf32>
    %33 = arith.maximumf %31, %32 : vector<2x48xf32>
    %c0_9 = arith.constant 0 : index
    %c0_10 = arith.constant 0 : index
    %34 = vector.load %arg1[%c0_9, %c0_10] : memref<384x128xbf16, #tpu.memory_space<vmem>>, vector<384x128xbf16>
    %c0_11 = arith.constant 0 : index
    %c0_12 = arith.constant 0 : index
    %35 = vector.load %arg3[%c0_11, %c0_12] : memref<128x48xbf16, #tpu.memory_space<vmem>>, vector<128x48xbf16>
    %cst_13 = arith.constant dense<0.000000e+00> : vector<384x48xf32>
    %36 = tpu.matmul %34, %35, %cst_13 {dimension_numbers = #tpu.dot_dimension_numbers<[1], [0], [0], [1], [0, 0, 1, 1], [], []>} : vector<384x128xbf16>, vector<128x48xbf16>, vector<384x48xf32> -> vector<384x48xf32>
    %37 = vector.shape_cast %36 : vector<384x48xf32> to vector<24x16x48xf32>
    %cst_14 = arith.constant -1.000000e+30 : f32
    %38 = vector.shape_cast %19 : vector<1x16x48xi1> to vector<1x16x48xi1>
    %39 = vector.broadcast %38 : vector<1x16x48xi1> to vector<24x16x48xi1>
    %40 = vector.broadcast %cst_14 : f32 to vector<24x16x48xf32>
    %41 = arith.select %39, %37, %40 : vector<24x16x48xi1>, vector<24x16x48xf32>
    %cst_15 = arith.constant dense<0xFF800000> : vector<24x48xf32>
    %42 = vector.multi_reduction <maximumf>, %41, %cst_15 [1] : vector<24x16x48xf32> to vector<24x48xf32>
    %43 = vector.extract_strided_slice %0 {offsets = [1, 0], sizes = [1, 48], strides = [1, 1]} : vector<9x128xf32> to vector<1x48xf32>
    %44 = vector.broadcast %43 : vector<1x48xf32> to vector<24x48xf32>
    %45 = arith.addf %42, %44 : vector<24x48xf32>
    %cst_16 = arith.constant 0.000000e+00 : f32
    %46 = vector.broadcast %cst_16 : f32 to vector<24x48xf32>
    %47 = arith.maximumf %45, %46 : vector<24x48xf32>
    %c0_17 = arith.constant 0 : index
    %c0_18 = arith.constant 0 : index
    %48 = vector.load %arg7[%c0_17, %c0_18] : memref<48x32xbf16, #tpu.memory_space<vmem>>, vector<48x32xbf16>
    %49 = arith.truncf %47 : vector<24x48xf32> to vector<24x48xbf16>
    %cst_19 = arith.constant dense<0.000000e+00> : vector<24x32xf32>
    %50 = tpu.matmul %49, %48, %cst_19 {dimension_numbers = #tpu.dot_dimension_numbers<[1], [0], [0], [1], [0, 0, 1, 1], [], []>} : vector<24x48xbf16>, vector<48x32xbf16>, vector<24x32xf32> -> vector<24x32xf32>
    %51 = vector.extract_strided_slice %0 {offsets = [2, 0], sizes = [1, 32], strides = [1, 1]} : vector<9x128xf32> to vector<1x32xf32>
    %52 = vector.broadcast %51 : vector<1x32xf32> to vector<24x32xf32>
    %53 = arith.addf %50, %52 : vector<24x32xf32>
    %54 = math.tanh %53 : vector<24x32xf32>
    %c0_20 = arith.constant 0 : index
    %c0_21 = arith.constant 0 : index
    %55 = vector.load %arg4[%c0_20, %c0_21] : memref<24x8xbf16, #tpu.memory_space<vmem>>, vector<24x8xbf16>
    %c0_22 = arith.constant 0 : index
    %c0_23 = arith.constant 0 : index
    %56 = vector.load %arg8[%c0_22, %c0_23] : memref<8x32xbf16, #tpu.memory_space<vmem>>, vector<8x32xbf16>
    %cst_24 = arith.constant dense<0.000000e+00> : vector<24x32xf32>
    %57 = tpu.matmul %55, %56, %cst_24 {dimension_numbers = #tpu.dot_dimension_numbers<[1], [0], [0], [1], [0, 0, 1, 1], [], []>} : vector<24x8xbf16>, vector<8x32xbf16>, vector<24x32xf32> -> vector<24x32xf32>
    %58 = vector.extract_strided_slice %0 {offsets = [3, 0], sizes = [1, 32], strides = [1, 1]} : vector<9x128xf32> to vector<1x32xf32>
    %59 = vector.broadcast %58 : vector<1x32xf32> to vector<24x32xf32>
    %60 = arith.addf %57, %59 : vector<24x32xf32>
    %61 = math.tanh %60 : vector<24x32xf32>
    %62 = arith.addf %54, %61 : vector<24x32xf32>
    %63 = math.tanh %62 : vector<24x32xf32>
    %c0_25 = arith.constant 0 : index
    %c0_26 = arith.constant 0 : index
    %64 = vector.load %arg6[%c0_25, %c0_26] : memref<13x1xf32, #tpu.memory_space<vmem>>, vector<13x1xf32>
    %c0_27 = arith.constant 0 : index
    %c0_28 = arith.constant 0 : index
    %65 = vector.load %arg5[%c0_27, %c0_28] : memref<13x24xf32, #tpu.memory_space<vmem>>, vector<13x24xf32>
    %66 = vector.broadcast %64 : vector<13x1xf32> to vector<13x24xf32>
    %67 = arith.mulf %66, %65 : vector<13x24xf32>
    %cst_29 = arith.constant dense<0.000000e+00> : vector<24xf32>
    %68 = vector.multi_reduction <add>, %67, %cst_29 [0] : vector<13x24xf32> to vector<24xf32>
    %69 = vector.shape_cast %68 : vector<24xf32> to vector<1x24xf32>
    %70 = vector.extract_strided_slice %0 {offsets = [8, 0], sizes = [1, 1], strides = [1, 1]} : vector<9x128xf32> to vector<1x1xf32>
    %71 = vector.broadcast %70 : vector<1x1xf32> to vector<1x24xf32>
    %72 = arith.addf %69, %71 : vector<1x24xf32>
    %73 = math.tanh %72 : vector<1x24xf32>
    %c0_30 = arith.constant 0 : index
    %c0_31 = arith.constant 0 : index
    %74 = vector.load %arg13[%c0_30, %c0_31] : memref<24x24xbf16, #tpu.memory_space<vmem>>, vector<24x24xbf16>
    %75 = arith.truncf %73 : vector<1x24xf32> to vector<1x24xbf16>
    %cst_32 = arith.constant dense<0.000000e+00> : vector<1x24xf32>
    %76 = tpu.matmul %75, %74, %cst_32 {dimension_numbers = #tpu.dot_dimension_numbers<[1], [0], [0], [1], [0, 0, 1, 1], [], []>} : vector<1x24xbf16>, vector<24x24xbf16>, vector<1x24xf32> -> vector<1x24xf32>
    %77 = vector.extract_strided_slice %0 {offsets = [6, 0], sizes = [1, 24], strides = [1, 1]} : vector<9x128xf32> to vector<1x24xf32>
    %78 = arith.addf %76, %77 : vector<1x24xf32>
    %c0_33 = arith.constant 0 : index
    %c0_34 = arith.constant 0 : index
    %79 = vector.load %arg9[%c0_33, %c0_34] : memref<48x24xbf16, #tpu.memory_space<vmem>>, vector<48x24xbf16>
    %80 = arith.truncf %33 : vector<2x48xf32> to vector<2x48xbf16>
    %cst_35 = arith.constant dense<0.000000e+00> : vector<2x24xf32>
    %81 = tpu.matmul %80, %79, %cst_35 {dimension_numbers = #tpu.dot_dimension_numbers<[1], [0], [0], [1], [0, 0, 1, 1], [], []>} : vector<2x48xbf16>, vector<48x24xbf16>, vector<2x24xf32> -> vector<2x24xf32>
    %82 = vector.extract_strided_slice %0 {offsets = [4, 0], sizes = [1, 24], strides = [1, 1]} : vector<9x128xf32> to vector<1x24xf32>
    %83 = vector.broadcast %82 : vector<1x24xf32> to vector<2x24xf32>
    %84 = arith.addf %81, %83 : vector<2x24xf32>
    %c0_36 = arith.constant 0 : index
    %c0_37 = arith.constant 0 : index
    %85 = vector.load %arg10[%c0_36, %c0_37] : memref<48x32xbf16, #tpu.memory_space<vmem>>, vector<48x32xbf16>
    %86 = arith.truncf %33 : vector<2x48xf32> to vector<2x48xbf16>
    %cst_38 = arith.constant dense<0.000000e+00> : vector<2x32xf32>
    %87 = tpu.matmul %86, %85, %cst_38 {dimension_numbers = #tpu.dot_dimension_numbers<[1], [0], [0], [1], [0, 0, 1, 1], [], []>} : vector<2x48xbf16>, vector<48x32xbf16>, vector<2x32xf32> -> vector<2x32xf32>
    %88 = vector.extract_strided_slice %0 {offsets = [5, 0], sizes = [1, 32], strides = [1, 1]} : vector<9x128xf32> to vector<1x32xf32>
    %89 = vector.broadcast %88 : vector<1x32xf32> to vector<2x32xf32>
    %90 = arith.addf %87, %89 : vector<2x32xf32>
    %91 = math.tanh %90 : vector<2x32xf32>
    "tpu.trace_start"() <{level = 10 : i32, message = "bf,af->ba"}> : () -> ()
    %cst_39 = arith.constant dense<0.000000e+00> : vector<2x24xf32>
    %92 = tpu.matmul %91, %63, %cst_39 {dimension_numbers = #tpu.dot_dimension_numbers<[1], [1], [0], [0], [0, 0, 1, 0], [], []>} : vector<2x32xf32>, vector<24x32xf32>, vector<2x24xf32> -> vector<2x24xf32>
    "tpu.trace_stop"() : () -> ()
    %93 = math.tanh %92 : vector<2x24xf32>
    %c0_40 = arith.constant 0 : index
    %c0_41 = arith.constant 0 : index
    %94 = vector.load %arg11[%c0_40, %c0_41] : memref<24x24xbf16, #tpu.memory_space<vmem>>, vector<24x24xbf16>
    %95 = arith.truncf %84 : vector<2x24xf32> to vector<2x24xbf16>
    %cst_42 = arith.constant dense<0.000000e+00> : vector<2x24xf32>
    %96 = tpu.matmul %95, %94, %cst_42 {dimension_numbers = #tpu.dot_dimension_numbers<[1], [0], [0], [1], [0, 0, 1, 1], [], []>} : vector<2x24xbf16>, vector<24x24xbf16>, vector<2x24xf32> -> vector<2x24xf32>
    %c0_43 = arith.constant 0 : index
    %c0_44 = arith.constant 0 : index
    %97 = vector.load %arg12[%c0_43, %c0_44] : memref<24x24xbf16, #tpu.memory_space<vmem>>, vector<24x24xbf16>
    %98 = arith.truncf %93 : vector<2x24xf32> to vector<2x24xbf16>
    %cst_45 = arith.constant dense<0.000000e+00> : vector<2x24xf32>
    %99 = tpu.matmul %98, %97, %cst_45 {dimension_numbers = #tpu.dot_dimension_numbers<[1], [0], [0], [1], [0, 0, 1, 1], [], []>} : vector<2x24xbf16>, vector<24x24xbf16>, vector<2x24xf32> -> vector<2x24xf32>
    %100 = arith.addf %96, %99 : vector<2x24xf32>
    %101 = vector.broadcast %78 : vector<1x24xf32> to vector<2x24xf32>
    %102 = arith.addf %100, %101 : vector<2x24xf32>
    %c0_46 = arith.constant 0 : index
    %c0_47 = arith.constant 0 : index
    %103 = vector.load %arg14[%c0_46, %c0_47] : memref<24x32xbf16, #tpu.memory_space<vmem>>, vector<24x32xbf16>
    %104 = arith.truncf %102 : vector<2x24xf32> to vector<2x24xbf16>
    %cst_48 = arith.constant dense<0.000000e+00> : vector<2x32xf32>
    %105 = tpu.matmul %104, %103, %cst_48 {dimension_numbers = #tpu.dot_dimension_numbers<[1], [0], [0], [1], [0, 0, 1, 1], [], []>} : vector<2x24xbf16>, vector<24x32xbf16>, vector<2x32xf32> -> vector<2x32xf32>
    %106 = vector.extract_strided_slice %0 {offsets = [7, 0], sizes = [1, 32], strides = [1, 1]} : vector<9x128xf32> to vector<1x32xf32>
    %107 = vector.broadcast %106 : vector<1x32xf32> to vector<2x32xf32>
    %108 = arith.addf %105, %107 : vector<2x32xf32>
    %109 = arith.negf %108 : vector<2x32xf32>
    %110 = math.exp %109 : vector<2x32xf32>
    %cst_49 = arith.constant 1.000000e+00 : f32
    %111 = vector.broadcast %cst_49 : f32 to vector<2x32xf32>
    %112 = arith.addf %111, %110 : vector<2x32xf32>
    %113 = arith.divf %111, %112 : vector<2x32xf32>
    %c0_50 = arith.constant 0 : index
    %c0_51 = arith.constant 0 : index
    %114 = vector.load %arg16[%c0_50, %c0_51] : memref<2x32xf32, #tpu.memory_space<vmem>>, vector<2x32xf32>
    tpu.vector_store %arg16[%c0_50, %c0_51], %113 {strides = array<i32>} : memref<2x32xf32, #tpu.memory_space<vmem>>, vector<2x32xf32>,
    return
  }
}

</mosaic_0001>

<bundles_post_ra>
// kernel: mtfmpp_forward.1
= control target key start
LH: loop header
LB: loop body
LE: loop exit
PB: predicated region body
PF: predicated region fallthrough
CT: control target
= control target key end

     0   :  { %v1794_v7 = vmov 0   ;;  %vm1095_vm0 = vcmask 1043456   ;;  %vm1088_vm1 = vcmask 64512   ;;  %vm1142_vm2 = vcmask 195584   ;;  %s2409_s2 = inlined_call_operand.vmem [shape: bf16[128,48], index: 2, kind: input, shape index: {}]   ;;  %s2410_s3 = inlined_call_operand.vmem [shape: bf16[128,48], index: 3, kind: input, shape index: {}]   ;;  %s2411_s6 = inlined_call_operand.vmem [shape: f32[13,1], index: 6, kind: input, shape index: {}]   ;;  %s2412_s0 = inlined_call_operand.vmem [shape: bf16[32,128], index: 0, kind: input, shape index: {}]   ;;  %s2413_s1 = inlined_call_operand.vmem [shape: bf16[384,128], index: 1, kind: input, shape index: {}]   ;;  %s2414_s15 = inlined_call_operand.vmem [shape: f32[9,128], index: 15, kind: input, shape index: {}]   ;;  %s2415_s8 = inlined_call_operand.vmem [shape: bf16[8,32], index: 8, kind: input, shape index: {}]   ;;  %s2416_s5 = inlined_call_operand.vmem [shape: f32[13,24], index: 5, kind: input, shape index: {}]   ;;  %s2417_s4 = inlined_call_operand.vmem [shape: bf16[24,8], index: 4, kind: input, shape index: {}]   ;;  %s2418_s13 = inlined_call_operand.vmem [shape: bf16[24,24], index: 13, kind: input, shape index: {}]   ;;  %s2419_s10 = inlined_call_operand.vmem [shape: bf16[48,32], index: 10, kind: input, shape index: {}]   ;;  %s2420_s7 = inlined_call_operand.vmem [shape: bf16[48,32], index: 7, kind: input, shape index: {}]   ;;  %s2421_s9 = inlined_call_operand.vmem [shape: bf16[48,24], index: 9, kind: input, shape index: {}]   ;;  %s2422_s12 = inlined_call_operand.vmem [shape: bf16[24,24], index: 12, kind: input, shape index: {}]   ;;  %s2423_s11 = inlined_call_operand.vmem [shape: bf16[24,24], index: 11, kind: input, shape index: {}]   ;;  %s2424_s14 = inlined_call_operand.vmem [shape: bf16[24,32], index: 14, kind: input, shape index: {}]   ;;  %s2425_s16 = inlined_call_operand.vmem [shape: f32[2,32], index: 16, kind: output, shape index: {}]  }
   0x1   :  { %2427 = sst [smem:[#allocation2_spill]] %s2409_s2  ;;  %v1722_v1 = vld [vmem:[%s2410_s3 + $0x38] sm:$0xff]  ;;  %v1893_v3 = vld [vmem:[%s2410_s3 + $0x30] sm:$0xff]  ;;  %v1720_v5 = vld [vmem:[%s2410_s3 + $0x28] sm:$0xff]  ;;  %1763 = vset.pattern.permute.xlu0 %v1794_v7  ;;  %1764 = vset.pattern.permute.xlu1 %v1794_v7  ;;  %vm1144_vm3 = vcmask 192512   ;;  %v56_v58 = vlaneseq  ;;  %v1795_v7 = vmov 15  }
   0x2   :  { %s2428_s23 = sld [smem:[#allocation2_spill]]  ;;  %1737 = vmatpush.bf16.msra.mxu1 %v1722_v1  ;;  %1738 = vmatpush.bf16.msra.mxu2 %v1722_v1  ;;  %v1126_v6 = vld [vmem:[%s2411_s6] sm:$0xff]  ;;  %v1718_v11 = vld [vmem:[%s2410_s3 + $0x18] sm:$0xff]  ;;  %v1127_v12 = vld [vmem:[%s2411_s6 + $0x8] sm:$0x1f]  ;;  %vm178_vm12 = vcmask 392192  }
   0x3   :  { %1739 = vmatpush.bf16.msra.mxu3 %v1722_v1  ;;  %1132 = vperm.xlu0 %1763, %v1126_v6   ;;  %v1719_v9 = vld [vmem:[%s2410_s3 + $0x20] sm:$0xff]  ;;  %v1717_v14 = vld [vmem:[%s2410_s3 + $0x10] sm:$0xff]  ;;  %v1716_v16 = vld [vmem:[%s2410_s3 + $0x8] sm:$0xff]  ;;  %v60_v62 = vand.u32 127, %v56_v58  ;;  %vm980_vm13 = vcmask 1041409   ;;  %vm983_vm14 = vcmask 1042434  }
   0x4   :  { %v1715_v18 = vld [vmem:[%s2410_s3] sm:$0xff]  ;;  %v1697_v20 = vld [vmem:[%s2413_s1 + $0x30] sm:$0xff]  ;;  %v1706_v21 = vld [vmem:[%s2413_s1 + $0x78] sm:$0xff]  ;;  %vm986_vm15 = vcmask 1043459  }
   0x5   :  { %v1681_v19 = vld [vmem:[%s2412_s0] sm:$0xff]  ;;  %v55_v23 = vld [vmem:[%s2414_s15 + $0x8] sm:$0x1]  ;;  %v1698_v25 = vld [vmem:[%s2413_s1 + $0x38] sm:$0xff]  ;;  %vm61_vm4 = vcmp.ge.s32.totalorder %v60_v62, 16  ;;  %vm62_vm5 = vcmp.lt.s32.totalorder %v60_v62, 32 }
   0x6   :  { %1740 = vmatpush.bf16.msra.mxu1 %v1893_v3  ;;  %1741 = vmatpush.bf16.msra.mxu2 %v1893_v3  ;;  %v1711_v22 = vld [vmem:[%s2413_s1 + $0xa0] sm:$0xff]  ;;  %v1682_v24 = vld [vmem:[%s2412_s0 + $0x8] sm:$0xff]  ;;  %v1713_v31 = vld [vmem:[%s2413_s1 + $0xb0] sm:$0xff]  ;;  %vm65_vm7 = vcmp.ge.s32.totalorder %v60_v62, 32  ;;  %vm66_vm8 = vcmp.lt.s32.totalorder %v60_v62, 48 }
   0x7   :  { %1742 = vmatpush.bf16.msra.mxu3 %v1893_v3  ;;  %1155 = vperm.xlu1 %1764, %v55_v23   ;;  %v1707_v26 = vld [vmem:[%s2413_s1 + $0x80] sm:$0xff]  ;;  %v1712_v27 = vld [vmem:[%s2413_s1 + $0xa8] sm:$0xff]  ;;  %v1709_v34 = vld [vmem:[%s2413_s1 + $0x90] sm:$0xff] }
   0x8   :  { %v1690_v0 = vld [vmem:[%s2428_s23 + $0x38] sm:$0xff]  ;;  %v1689_v2 = vld [vmem:[%s2428_s23 + $0x30] sm:$0xff]  ;;  %v1688_v4 = vld [vmem:[%s2428_s23 + $0x28] sm:$0xff] }
   0x9   :  { %151 = vmatpush.bf16.msra.mxu0 %v1690_v0  ;;  %v1687_v8 = vld [vmem:[%s2428_s23 + $0x20] sm:$0xff]  ;;  %v1686_v10 = vld [vmem:[%s2428_s23 + $0x18] sm:$0xff]  ;;  %v1685_v13 = vld [vmem:[%s2428_s23 + $0x10] sm:$0xff] }
   0xa   :  { %1743 = vmatpush.bf16.msra.mxu1 %v1720_v5  ;;  %1744 = vmatpush.bf16.msra.mxu2 %v1720_v5  ;;  %v1684_v15 = vld [vmem:[%s2428_s23 + $0x8] sm:$0xff]  ;;  %v1683_v17 = vld [vmem:[%s2428_s23] sm:$0xff]  ;;  %v1714_v35 = vld [vmem:[%s2413_s1 + $0xb8] sm:$0xff] }
   0xb   :  { %1745 = vmatpush.bf16.msra.mxu3 %v1720_v5  ;;  %1137 = vperm.xlu0 %1763, %v1127_v12   ;;  %v1691_v28 = vld [vmem:[%s2413_s1] sm:$0xff]  ;;  %v1708_v30 = vld [vmem:[%s2413_s1 + $0x88] sm:$0xff]  ;;  %v1693_v36 = vld [vmem:[%s2413_s1 + $0x10] sm:$0xff]  ;;  %v57_v12 = vshrl.u32 %v56_v58, 7 }
   0xc   :  { %v1699_v29 = vld [vmem:[%s2413_s1 + $0x40] sm:$0xff]  ;;  %v1692_v32 = vld [vmem:[%s2413_s1 + $0x8] sm:$0xff]  ;;  %v1701_v37 = vld [vmem:[%s2413_s1 + $0x50] sm:$0xff] }
   0xd   :  { %152 = vmatpush.bf16.msra.mxu0 %v1689_v2  ;;  %v1700_v33 = vld [vmem:[%s2413_s1 + $0x48] sm:$0xff]  ;;  %v1710_v38 = vld [vmem:[%s2413_s1 + $0x98] sm:$0xff]  ;;  %v1695_v41 = vld [vmem:[%s2413_s1 + $0x20] sm:$0xff] }
   0xe   :  { %1746 = vmatpush.bf16.msra.mxu1 %v1719_v9  ;;  %1747 = vmatpush.bf16.msra.mxu2 %v1719_v9  ;;  %v1694_v39 = vld [vmem:[%s2413_s1 + $0x18] sm:$0xff]  ;;  %v1703_v42 = vld [vmem:[%s2413_s1 + $0x60] sm:$0xff]  ;;  %v1129_v50 = vld [vmem:[%s2416_s5 + $0x8] sm:$0x1f] }
   0xf   :  { %1748 = vmatpush.bf16.msra.mxu3 %v1719_v9  ;;  %v1702_v40 = vld [vmem:[%s2413_s1 + $0x58] sm:$0xff]  ;;  %v1078_v44 = vld [vmem:[%s2415_s8] sm:$0xf]  ;;  %v1696_v55 = vld [vmem:[%s2413_s1 + $0x28] sm:$0xff] }
  0x10   :  { %v1097_v45 = vsel %vm1095_vm0, %v1078_v44, 0  ;;  %v1128_v46 = vld [vmem:[%s2416_s5] sm:$0xff]  ;;  %v1704_v56 = vld [vmem:[%s2413_s1 + $0x68] sm:$0xff]  ;;  %vm63_vm6 = vmand %vm61_vm4, %vm62_vm5  ;;  %vm995_vm4 = vcmask 1046534   ;;  %vm998_vm5 = vcmask 1047559  }
  0x11   :  { %153 = vmatpush.bf16.msra.mxu0 %v1688_v4  ;;  %v1726_v47 = vld [vmem:[%s2417_s4] sm:$0xff]  ;;  %v1077_v59 = vld [vmem:[%s2417_s4 + $0x8] sm:$0xf]  ;;  %vm67_vm9 = vmand %vm65_vm7, %vm66_vm8  ;;  %vm1436_vm8 = vcmask 254976  }
  0x12   :  { %1749 = vmatpush.bf16.msra.mxu1 %v1718_v11  ;;  %1750 = vmatpush.bf16.msra.mxu2 %v1718_v11  ;;  %v1085_v61 = vunpack.c.l.b16 %v1077_v59  ;;  %v1162_v4 = vld [vmem:[%s2418_s13 + $0x8] sm:$0xf]  ;;  %v1731_v44 = vld [vmem:[%s2419_s10] sm:$0xff] }
  0x13   :  { %1751 = vmatpush.bf16.msra.mxu3 %v1718_v11  ;;  %v1169_v6 = vunpack.c.l.b16 %v1162_v4  ;;  %v2101_v62 = vld [vmem:[%s2414_s15] sm:$0xff] }
  0x14   :  { %v1087_v63 = vpack.c.b16 %v1085_v61, %v1085_v61 }
  0x15   :  { %154 = vmatpush.bf16.msra.mxu0 %v1687_v8  ;;  %v64_v8 = vsel %vm63_vm6, 14, %v1795_v7  ;;  %vm1284_vm6 = vcmask 261120  }
  0x16   :  { %1752 = vmatpush.bf16.msra.mxu1 %v1717_v14  ;;  %1753 = vmatpush.bf16.msra.mxu2 %v1717_v14 }
  0x17   :  { %1754 = vmatpush.bf16.msra.mxu3 %v1717_v14 }
  0x19   :  { %155 = vmatpush.bf16.msra.mxu0 %v1686_v10  ;;  %v1705_v10 = vld [vmem:[%s2413_s1 + $0x70] sm:$0xff] }
  0x1a   :  { %1755 = vmatpush.bf16.msra.mxu1 %v1716_v16  ;;  %1756 = vmatpush.bf16.msra.mxu2 %v1716_v16 }
  0x1b   :  { %1757 = vmatpush.bf16.msra.mxu3 %v1716_v16 }
  0x1d   :  { %156 = vmatpush.bf16.msra.mxu0 %v1685_v13 }
  0x1e   :  { %1758 = vmatpush.bf16.msra.mxu1 %v1715_v18  ;;  %1759 = vmatpush.bf16.msra.mxu2 %v1715_v18 }
  0x1f   :  { %1760 = vmatpush.bf16.msra.mxu3 %v1715_v18 }
  0x21   :  { %157 = vmatpush.bf16.msra.mxu0 %v1684_v15  ;;  %496 = vmatmul.bf16.vlgmr.msra.gmra.mxu1 %v1697_v20  ;;  %v68_v15 = vsel %vm67_vm9, 13, %v64_v8 }
  0x22   :  { %541 = vmatmul.bf16.vlgmr.msra.gmra.mxu2 %v1706_v21  ;;  %566 = vmatmul.bf16.vlgmr.msra.gmra.mxu3 %v1711_v22  ;;  %vm2045_vm10 = vcmp.lt.s32.totalorder %v57_v12, %v68_v15 }
  0x23   :  { %1106 = vmatpush.bf16.msrb.mxu3 %v1097_v45 }
  0x25   :  { %158 = vmatpush.bf16.msra.mxu0 %v1683_v17  ;;  %v58_v17 = vadd.s32 8, %v57_v12 }
  0x27   :  { %vm2054_vm11 = vcmp.lt.s32.totalorder %v58_v17, %v68_v15 }
  0x28   :  { %159 = vmatmul.bf16.vlgmr.msra.gmra.mxu0 %v1681_v19  ;;  %v1727_v19 = vld [vmem:[%s2418_s13] sm:$0xff] }
  0x29   :  { %458 = vmatpush.bf16.msrb.mxu0 %v1722_v1 }
  0x2d   :  { %459 = vmatpush.bf16.msrb.mxu0 %v1893_v3 }
  0x31   :  { %460 = vmatpush.bf16.msrb.mxu0 %v1720_v5  ;;  %501 = vmatmul.bf16.gmra.mxu1 %v1698_v25 }
  0x32   :  { %546 = vmatmul.bf16.gmra.mxu2 %v1707_v26  ;;  %571 = vmatmul.bf16.gmra.mxu3 %v1712_v27 }
  0x35   :  { %461 = vmatpush.bf16.msrb.mxu0 %v1719_v9 }
  0x38   :  { %164 = vmatmul.bf16.gmra.mxu0 %v1682_v24 }
  0x39   :  { %462 = vmatpush.bf16.msrb.mxu0 %v1718_v11  ;;  %v1171_v11 = vpack.c.b16 %v1169_v6, %v1169_v6  ;;  %v197_v6 = vperm.slane %v2101_v62, 0 }
  0x3d   :  { %463 = vmatpush.bf16.msrb.mxu0 %v1717_v14 }
  0x41   :  { %464 = vmatpush.bf16.msrb.mxu0 %v1716_v16  ;;  %506 = vmatmul.bf16.gmra.mxu1 %v1699_v29  ;;  %v1180_v16 = vsel %vm1095_vm0, %v1171_v11, 0 }
  0x42   :  { %551 = vmatmul.bf16.gmra.mxu2 %v1708_v30  ;;  %576 = vmatmul.bf16.gmra.mxu3 %v1713_v31 }
  0x43   :  { %1188 = vmatpush.bf16.msra.mxu3 %v1180_v16 }
  0x45   :  { %465 = vmatpush.bf16.msrb.mxu0 %v1715_v18 }
  0x47   :  { %1189 = vmatpush.bf16.msra.mxu3 %v1727_v19 }
  0x48   :  { %466 = vmatmul.bf16.vlgmr.msrb.gmra.mxu0 %v1691_v28 }
  0x51   :  { %511 = vmatmul.bf16.gmra.mxu1 %v1700_v33 }
  0x52   :  { %556 = vmatmul.bf16.gmra.mxu2 %v1709_v34  ;;  %581 = vmatmul.bf16.gmra.mxu3 %v1714_v35 }
  0x58   :  { %471 = vmatmul.bf16.gmra.mxu0 %v1692_v32 }
  0x61   :  { %516 = vmatmul.bf16.gmra.mxu1 %v1701_v37 }
  0x62   :  { %561 = vmatmul.bf16.gmra.mxu2 %v1710_v38  ;;  %1628 = vmatmul.msk.bf16.vlgmr.msrb.gmra.mxu3 %vm1088_vm1, %v1726_v47 }
  0x68   :  { %476 = vmatmul.bf16.gmra.mxu0 %v1693_v36  ;;  %v1733_v36 = vld [vmem:[%s2419_s10 + $0x10] sm:$0xff] }
  0x69   :  { %1275 = vmatpush.bf16.msrb.mxu3 %v1733_v36 }
  0x71   :  { %521 = vmatmul.bf16.gmra.mxu1 %v1702_v40 }
  0x72   :  { %1629 = vmatmul.msk.bf16.gmra.mxu3 %vm1088_vm1, %v1087_v63  ;;  %vm989_vm1 = vcmask 1044484  }
  0x75   :  { %v1133_v43 = vpop.permute.xlu0 %1132 }
  0x76   :  { %v1140_v48 = vmul.f32 %v1133_v43, %v1128_v46 }
  0x78   :  { %481 = vmatmul.bf16.gmra.mxu0 %v1694_v39  ;;  %v1143_v51 = vsel %vm1142_vm2, %v1140_v48, 0.0 }
  0x79   :  { %v1156_v5 = vpop.permute.xlu1 %1155 }
  0x7d   :  { %v1138_v49 = vpop.permute.xlu0 %1137 }
  0x7e   :  { %v1141_v52 = vmul.f32 %v1138_v49, %v1129_v50 }
  0x80   :  { %v1145_v53 = vsel %vm1144_vm3, %v1141_v52, 0.0  ;;  %vm992_vm3 = vcmask 1045509  }
  0x81   :  { %526 = vmatmul.bf16.gmra.mxu1 %v1703_v42  ;;  %v1146_v54 = vadd.f32 %v1145_v53, %v1143_v51  ;;  %v1732_v42 = vld [vmem:[%s2419_s10 + $0x8] sm:$0xff] }
  0x82   :  { %1276 = vmatpush.bf16.msrb.mxu3 %v1732_v42 }
  0x83   :  { %v1147_v57 = vrot.slane %v1146_v54, 4 }
  0x85   :  { %v1148_v60 = vadd.f32 %v1147_v57, %v1146_v54 }
  0x86   :  { %1277 = vmatpush.bf16.msrb.mxu3 %v1731_v44 }
  0x87   :  { %v1149_v0 = vrot.slane %v1148_v60, 2 }
  0x88   :  { %486 = vmatmul.bf16.gmra.mxu0 %v1695_v41 }
  0x89   :  { %v1150_v1 = vadd.f32 %v1149_v0, %v1148_v60 }
  0x8b   :  { %v1151_v2 = vrot.slane %v1150_v1, 1 }
  0x8d   :  { %v1152_v3 = vadd.f32 %v1151_v2, %v1150_v1 }
  0x8f   :  { %v1158_v9 = vadd.f32 %v1156_v5, %v1152_v3 }
  0x91   :  { %531 = vmatmul.bf16.gmra.mxu1 %v1704_v56  ;;  %1765 = vtanh.f32 %v1158_v9 }
  0x97   :  { %v1766_v21 = vpop.eup %1765 }
  0x98   :  { %491 = vmatmul.bf16.gmra.mxu0 %v1696_v55  ;;  %v1163_v25 = vpack.c.bf16 %v1766_v21, %v1766_v21 }
  0x9a   :  { %1634 = vmatmul.msk.bf16.vlgmr.msra.gmra.mxu3 %vm1142_vm2, %v1163_v25 }
  0x9e   :  { %v497_v14 = vpop.f32.mrf.mxu1 }
  0x9f   :  { %v599_v23 = vsel %vm2045_vm10, %v497_v14, -1e+30 }
  0xa0   :  { %v689_v31 = vsel %vm178_vm12, %v599_v23, -inf }
  0xa1   :  { %536 = vmatmul.bf16.gmra.mxu1 %v1705_v10 }
  0xa5   :  { %v160_v13 = vpop.f32.mrf.mxu0  ;;  %v2060_v24 = vpop.f32.mrf.mxu2 }
  0xa6   :  { %v174_v20 = vsel %vm2045_vm10, %v160_v13, -1e+30  ;;  %v499_v28 = vpop.f32.mrf.mxu1  ;;  %v567_v38 = vpop.f32.mrf.mxu3 }
  0xa7   :  { %v179_v26 = vsel %vm178_vm12, %v174_v20, -inf  ;;  %v600_v30 = vsel %vm2054_vm11, %v499_v28, -1e+30  ;;  %v627_v1 = vsel %vm2045_vm10, %v567_v38, -1e+30 }
  0xa8   :  { %v690_v33 = vsel %vm178_vm12, %v600_v30, -inf  ;;  %v815_v10 = vsel %vm178_vm12, %v627_v1, -inf }
  0xa9   :  { %v2071_v35 = vmax.f32 %v689_v31, %v690_v33 }
  0xad   :  { %v162_v27 = vpop.f32.mrf.mxu0  ;;  %v2076_v39 = vpop.f32.mrf.mxu2 }
  0xae   :  { %v175_v29 = vsel %vm2054_vm11, %v162_v27, -1e+30  ;;  %v502_v41 = vpop.f32.mrf.mxu1  ;;  %v569_v48 = vpop.f32.mrf.mxu3 }
  0xaf   :  { %v180_v32 = vsel %vm178_vm12, %v175_v29, -inf  ;;  %v601_v54 = vsel %vm2045_vm10, %v502_v41, -1e+30  ;;  %v628_v8 = vsel %vm2054_vm11, %v569_v48, -1e+30 }
  0xb0   :  { %v181_v34 = vmax.f32 %v179_v26, %v180_v32  ;;  %v698_v60 = vsel %vm178_vm12, %v601_v54, -inf  ;;  %v816_v12 = vsel %vm178_vm12, %v628_v8, -inf }
  0xb1   :  { %v2114_v16 = vmax.f32 %v815_v10, %v816_v12 }
  0xb2   :  { %v182_v37 = vrot.slane %v181_v34, 4 }
  0xb4   :  { %v183_v43 = vmax.f32 %v181_v34, %v182_v37 }
  0xb5   :  { %v165_v40 = vpop.f32.mrf.mxu0  ;;  %v2086_v47 = vpop.f32.mrf.mxu2 }
  0xb6   :  { %v184_v45 = vrot.slane %v183_v43, 2  ;;  %v176_v46 = vsel %vm2045_vm10, %v165_v40, -1e+30  ;;  %v504_v51 = vpop.f32.mrf.mxu1  ;;  %v572_v9 = vpop.f32.mrf.mxu3 }
  0xb7   :  { %v188_v49 = vsel %vm178_vm12, %v176_v46, -inf  ;;  %v602_v56 = vsel %vm2054_vm11, %v504_v51, -1e+30 }
  0xb8   :  { %v185_v52 = vmax.f32 %v183_v43, %v184_v45  ;;  %v699_v58 = vsel %vm178_vm12, %v602_v56, -inf  ;;  %v619_v45 = vsel %vm2045_vm10, %v2086_v47, -1e+30 }
  0xb9   :  { %v2103_v63 = vmax.f32 %v698_v60, %v699_v58  ;;  %v779_v47 = vsel %vm178_vm12, %v619_v45, -inf }
  0xba   :  { %v186_v59 = vrot.slane %v185_v52, 1 }
  0xbc   :  { %v187_v5 = vmax.f32 %v185_v52, %v186_v59 }
  0xbd   :  { %v167_v50 = vpop.f32.mrf.mxu0  ;;  %v549_v2 = vpop.f32.mrf.mxu2 }
  0xbe   :  { %v177_v53 = vsel %vm2054_vm11, %v167_v50, -1e+30  ;;  %v507_v4 = vpop.f32.mrf.mxu1  ;;  %v198_v13 = vadd.f32 %v197_v6, %v187_v5  ;;  %v574_v36 = vpop.f32.mrf.mxu3  ;;  %v620_v46 = vsel %vm2054_vm11, %v549_v2, -1e+30 }
  0xbf   :  { %v189_v55 = vsel %vm178_vm12, %v177_v53, -inf  ;;  %v603_v21 = vsel %vm2045_vm10, %v507_v4, -1e+30 }
  0xc0   :  { %v190_v57 = vmax.f32 %v188_v49, %v189_v55  ;;  %v200_v26 = vmax.f32 %v198_v13, 0.0  ;;  %v707_v32 = vsel %vm178_vm12, %v603_v21, -inf  ;;  %v629_v55 = vsel %vm2045_vm10, %v572_v9, -1e+30 }
  0xc2   :  { %v191_v61 = vrot.slane %v190_v57, 4  ;;  %v1201_v38 = vpack.c.bf16 %v200_v26, %v200_v26 }
  0xc4   :  { %v192_v0 = vmax.f32 %v190_v57, %v191_v61  ;;  %v1206_v51 = vunpack.c.l.b16 %v1201_v38  ;;  %v780_v57 = vsel %vm178_vm12, %v620_v46, -inf }
  0xc5   :  { %v467_v3 = vpop.f32.mrf.mxu0  ;;  %v552_v19 = vpop.f32.mrf.mxu2  ;;  %v781_v4 = vmax.f32 %v779_v47, %v780_v57 }
  0xc6   :  { %v193_v7 = vrot.slane %v192_v0, 2  ;;  %v587_v15 = vsel %vm2045_vm10, %v467_v3, -1e+30  ;;  %v509_v25 = vpop.f32.mrf.mxu1  ;;  %v621_v53 = vsel %vm2045_vm10, %v552_v19, -1e+30  ;;  %v577_v3 = vpop.f32.mrf.mxu3 }
  0xc7   :  { %v635_v20 = vsel %vm178_vm12, %v587_v15, -inf  ;;  %v604_v30 = vsel %vm2054_vm11, %v509_v25, -1e+30  ;;  %v788_v60 = vsel %vm178_vm12, %v621_v53, -inf }
  0xc8   :  { %v194_v11 = vmax.f32 %v192_v0, %v193_v7  ;;  %v708_v34 = vsel %vm178_vm12, %v604_v30, -inf  ;;  %v824_v0 = vsel %vm178_vm12, %v629_v55, -inf }
  0xc9   :  { %v709_v37 = vmax.f32 %v707_v32, %v708_v34 }
  0xca   :  { %v195_v14 = vrot.slane %v194_v11, 1 }
  0xcb   :  { %v710_v42 = vrot.slane %v709_v37, 4 }
  0xcc   :  { %v196_v17 = vmax.f32 %v194_v11, %v195_v14 }
  0xcd   :  { %v469_v23 = vpop.f32.mrf.mxu0  ;;  %v554_v44 = vpop.f32.mrf.mxu2  ;;  %v711_v54 = vmax.f32 %v709_v37, %v710_v42 }
  0xce   :  { %v199_v27 = vadd.f32 %v197_v6, %v196_v17  ;;  %v588_v28 = vsel %vm2054_vm11, %v469_v23, -1e+30  ;;  %v512_v50 = vpop.f32.mrf.mxu1  ;;  %v622_v56 = vsel %vm2054_vm11, %v554_v44, -1e+30  ;;  %v630_v6 = vsel %vm2054_vm11, %v574_v36, -1e+30 }
  0xcf   :  { %v636_v29 = vsel %vm178_vm12, %v588_v28, -inf  ;;  %v789_v2 = vsel %vm178_vm12, %v622_v56, -inf  ;;  %v712_v5 = vrot.slane %v711_v54, 2  ;;  %v825_v8 = vsel %vm178_vm12, %v630_v6, -inf }
  0xd0   :  { %v201_v31 = vmax.f32 %v199_v27, 0.0  ;;  %v637_v33 = vmax.f32 %v635_v20, %v636_v29  ;;  %v790_v7 = vmax.f32 %v788_v60, %v789_v2  ;;  %v605_v12 = vsel %vm2045_vm10, %v512_v50, -1e+30 }
  0xd1   :  { %v826_v15 = vmax.f32 %v824_v0, %v825_v8  ;;  %v782_v20 = vrot.slane %v781_v4, 4  ;;  %v713_v21 = vmax.f32 %v711_v54, %v712_v5  ;;  %v716_v25 = vsel %vm178_vm12, %v605_v12, -inf }
  0xd2   :  { %v1202_v40 = vpack.c.bf16 %v201_v31, %v201_v31  ;;  %v638_v41 = vrot.slane %v637_v33, 4  ;;  %v791_v26 = vrot.slane %v790_v7, 4  ;;  %v2172_v50 = vperm.slane %v2101_v62, 1 }
  0xd3   :  { %v714_v32 = vrot.slane %v713_v21, 1  ;;  %v783_v37 = vmax.f32 %v781_v4, %v782_v20  ;;  %v827_v5 = vrot.slane %v826_v15, 4 }
  0xd4   :  { %v1207_v43 = vunpack.c.l.b16 %v1202_v40  ;;  %v639_v48 = vmax.f32 %v637_v33, %v638_v41  ;;  %v818_v33 = vrot.slane %v2114_v16, 4  ;;  %v792_v38 = vmax.f32 %v790_v7, %v791_v26 }
  0xd5   :  { %v472_v49 = vpop.f32.mrf.mxu0  ;;  %v557_v9 = vpop.f32.mrf.mxu2  ;;  %v631_v41 = vsel %vm2045_vm10, %v577_v3, -1e+30  ;;  %v715_v54 = vmax.f32 %v713_v21, %v714_v32  ;;  %v784_v57 = vrot.slane %v783_v37, 2  ;;  %v828_v26 = vmax.f32 %v826_v15, %v827_v5 }
  0xd6   :  { %v1208_v52 = vrot.slane %v1207_v43, 7  ;;  %v640_v59 = vrot.slane %v639_v48, 2  ;;  %v589_v61 = vsel %vm2045_vm10, %v472_v49, -1e+30  ;;  %v514_v14 = vpop.f32.mrf.mxu1  ;;  %v623_v36 = vsel %vm2045_vm10, %v557_v9, -1e+30  ;;  %v579_v43 = vpop.f32.mrf.mxu3 }
  0xd7   :  { %v644_v11 = vsel %vm178_vm12, %v589_v61, -inf  ;;  %v606_v19 = vsel %vm2054_vm11, %v514_v14, -1e+30  ;;  %v632_v53 = vsel %vm2054_vm11, %v579_v43, -1e+30  ;;  %v819_v55 = vmax.f32 %v2114_v16, %v818_v33 }
  0xd8   :  { %v1209_v58 = vsel %vm980_vm13, %v1208_v52, %v1206_v51  ;;  %v641_v10 = vmax.f32 %v639_v48, %v640_v59  ;;  %v717_v28 = vsel %vm178_vm12, %v606_v19, -inf  ;;  %v797_v52 = vsel %vm178_vm12, %v623_v36, -inf }
  0xd9   :  { %v2144_v1 = vpack.c.b16 %v1209_v58, %v1209_v58  ;;  %v718_v30 = vmax.f32 %v716_v25, %v717_v28  ;;  %v833_v47 = vsel %vm178_vm12, %v631_v41, -inf  ;;  %v793_v58 = vrot.slane %v792_v38, 2 }
  0xda   :  { %v642_v29 = vrot.slane %v641_v10, 1  ;;  %v834_v3 = vsel %vm178_vm12, %v632_v53, -inf  ;;  %v860_v7 = vadd.f32 %v2172_v50, %v715_v54  ;;  %v820_v16 = vrot.slane %v819_v55, 2 }
  0xdb   :  { %1660 = vmatmul.msk.bf16.vlgmr.msrb.gmra.mxu3 %vm178_vm12, %v2144_v1  ;;  %v719_v34 = vrot.slane %v718_v30, 4  ;;  %v835_v6 = vmax.f32 %v833_v47, %v834_v3 }
  0xdc   :  { %v643_v44 = vmax.f32 %v641_v10, %v642_v29  ;;  %v785_v10 = vmax.f32 %v783_v37, %v784_v57  ;;  %v884_v29 = vmax.f32 %v860_v7, 0.0 }
  0xdd   :  { %v474_v13 = vpop.f32.mrf.mxu0  ;;  %v559_v42 = vpop.f32.mrf.mxu2  ;;  %v720_v45 = vmax.f32 %v718_v30, %v719_v34  ;;  %v836_v28 = vrot.slane %v835_v6, 4  ;;  %v821_v30 = vmax.f32 %v819_v55, %v820_v16 }
  0xde   :  { %v590_v17 = vsel %vm2054_vm11, %v474_v13, -1e+30  ;;  %v517_v48 = vpop.f32.mrf.mxu1  ;;  %v624_v49 = vsel %vm2054_vm11, %v559_v42, -1e+30  ;;  %v852_v61 = vadd.f32 %v2172_v50, %v643_v44  ;;  %v829_v44 = vrot.slane %v828_v26, 2 }
  0xdf   :  { %v645_v23 = vsel %vm178_vm12, %v590_v17, -inf  ;;  %v721_v56 = vrot.slane %v720_v45, 2  ;;  %v798_v60 = vsel %vm178_vm12, %v624_v49, -inf  ;;  %v607_v19 = vsel %vm2045_vm10, %v517_v48, -1e+30 }
  0xe0   :  { %v646_v27 = vmax.f32 %v644_v11, %v645_v23  ;;  %v799_v2 = vmax.f32 %v797_v52, %v798_v60  ;;  %v794_v11 = vmax.f32 %v792_v38, %v793_v58  ;;  %v876_v14 = vmax.f32 %v852_v61, 0.0 }
  0xe1   :  { %v722_v0 = vmax.f32 %v720_v45, %v721_v56  ;;  %v725_v36 = vsel %vm178_vm12, %v607_v19, -inf  ;;  %v786_v38 = vrot.slane %v785_v10, 1  ;;  %v837_v45 = vmax.f32 %v835_v6, %v836_v28 }
  0xe2   :  { %v647_v31 = vrot.slane %v646_v27, 4  ;;  %v800_v9 = vrot.slane %v799_v2, 4  ;;  %v795_v33 = vrot.slane %v794_v11, 1  ;;  %v906_v15 = vpack.c.bf16 %v876_v14, %v876_v14 }
  0xe3   :  { %v723_v8 = vrot.slane %v722_v0, 1  ;;  %v914_v48 = vpack.c.bf16 %v884_v29, %v884_v29  ;;  %v822_v49 = vrot.slane %v821_v30, 1  ;;  %v787_v56 = vmax.f32 %v785_v10, %v786_v38 }
  0xe4   :  { %v648_v40 = vmax.f32 %v646_v27, %v647_v31  ;;  %v801_v20 = vmax.f32 %v799_v2, %v800_v9  ;;  %v796_v53 = vmax.f32 %v794_v11, %v795_v33  ;;  %v838_v58 = vrot.slane %v837_v45, 2 }
  0xe5   :  { %v2167_v46 = vpop.f32.mrf.mxu0  ;;  %v562_v13 = vpop.f32.mrf.mxu2  ;;  %v724_v17 = vmax.f32 %v722_v0, %v723_v8  ;;  %v955_v61 = vunpack.c.l.b16 %v906_v15  ;;  %v830_v2 = vmax.f32 %v828_v26, %v829_v44  ;;  %v823_v5 = vmax.f32 %v821_v30, %v822_v49 }
  0xe6   :  { %v649_v51 = vrot.slane %v648_v40, 2  ;;  %v519_v23 = vpop.f32.mrf.mxu1  ;;  %v802_v32 = vrot.slane %v801_v20, 2  ;;  %v625_v3 = vsel %vm2045_vm10, %v562_v13, -1e+30  ;;  %v869_v8 = vadd.f32 %v2172_v50, %v796_v53  ;;  %v2225_v44 = vpop.f32.mrf.mxu3 }
  0xe7   :  { %v608_v27 = vsel %vm2054_vm11, %v519_v23, -1e+30  ;;  %v861_v31 = vadd.f32 %v2172_v50, %v724_v17  ;;  %v839_v14 = vmax.f32 %v837_v45, %v838_v58  ;;  %v806_v17 = vsel %vm178_vm12, %v625_v3, -inf }
  0xe8   :  { %v650_v59 = vmax.f32 %v648_v40, %v649_v51  ;;  %v726_v37 = vsel %vm178_vm12, %v608_v27, -inf  ;;  %v803_v41 = vmax.f32 %v801_v20, %v802_v32  ;;  %v831_v19 = vrot.slane %v830_v2, 1  ;;  %v1725_v20 = vld [vmem:[%s2420_s7 + $0x10] sm:$0xff] }
  0xe9   :  { %v885_v40 = vmax.f32 %v861_v31, 0.0  ;;  %v727_v42 = vmax.f32 %v725_v36, %v726_v37  ;;  %v868_v23 = vadd.f32 %v2172_v50, %v787_v56  ;;  %v893_v28 = vmax.f32 %v869_v8, 0.0  ;;  %1059 = vmatpush.bf16.msrb.mxu2 %v1725_v20 }
  0xea   :  { %v651_v4 = vrot.slane %v650_v59, 1  ;;  %v804_v55 = vrot.slane %v803_v41, 1  ;;  %v591_v29 = vsel %vm2045_vm10, %v2167_v46, -1e+30  ;;  %v692_v38 = vrot.slane %v2071_v35, 4 }
  0xeb   :  { %v915_v51 = vpack.c.bf16 %v885_v40, %v885_v40  ;;  %v728_v52 = vrot.slane %v727_v42, 4  ;;  %v832_v40 = vmax.f32 %v830_v2, %v831_v19  ;;  %v653_v46 = vsel %vm178_vm12, %v591_v29, -inf }
  0xec   :  { %v652_v12 = vmax.f32 %v650_v59, %v651_v4  ;;  %v963_v4 = vunpack.c.l.b16 %v914_v48  ;;  %v805_v10 = vmax.f32 %v803_v41, %v804_v55 }
  0xed   :  { %v2185_v21 = vpop.f32.mrf.mxu0  ;;  %v964_v47 = vunpack.c.l.b16 %v915_v51  ;;  %v729_v57 = vmax.f32 %v727_v42, %v728_v52  ;;  %v564_v16 = vpop.f32.mrf.mxu2  ;;  %v892_v42 = vmax.f32 %v868_v23, 0.0  ;;  %v923_v51 = vpack.c.bf16 %v893_v28, %v893_v28 }
  0xee   :  { %v853_v25 = vadd.f32 %v2172_v50, %v652_v12  ;;  %v2193_v60 = vpop.f32.mrf.mxu1  ;;  %v626_v13 = vsel %vm2054_vm11, %v564_v16, -1e+30  ;;  %v870_v31 = vadd.f32 %v2172_v50, %v805_v10  ;;  %v592_v32 = vsel %vm2054_vm11, %v2185_v21, -1e+30 }
  0xef   :  { %v1000_v6 = vrot.slane %v964_v47, 7  ;;  %v730_v7 = vrot.slane %v729_v57, 2  ;;  %v807_v27 = vsel %vm178_vm12, %v626_v13, -inf  ;;  %v654_v45 = vsel %vm178_vm12, %v592_v32, -inf }
  0xf0   :  { %v877_v34 = vmax.f32 %v853_v25, 0.0  ;;  %v872_v25 = vadd.f32 %v2172_v50, %v823_v5  ;;  %v808_v30 = vmax.f32 %v806_v17, %v807_v27  ;;  %v894_v52 = vmax.f32 %v870_v31, 0.0 }
  0xf1   :  { %v2202_v11 = vsel %vm980_vm13, %v1000_v6, %v963_v4  ;;  %v731_v12 = vmax.f32 %v729_v57, %v730_v7  ;;  %v873_v55 = vadd.f32 %v2172_v50, %v832_v40  ;;  %v655_v47 = vmax.f32 %v653_v46, %v654_v45 }
  0xf2   :  { %v907_v43 = vpack.c.bf16 %v877_v34, %v877_v34  ;;  %v840_v34 = vrot.slane %v839_v14, 1  ;;  %v809_v41 = vrot.slane %v808_v30, 4  ;;  %v896_v15 = vmax.f32 %v872_v25, 0.0 }
  0xf3   :  { %v732_v26 = vrot.slane %v731_v12, 1  ;;  %v972_v4 = vunpack.c.l.b16 %v923_v51  ;;  %v924_v5 = vpack.c.bf16 %v894_v52, %v894_v52  ;;  %v617_v10 = vsel %vm2045_vm10, %v2060_v24, -1e+30 }
  0xf4   :  { %v956_v54 = vunpack.c.l.b16 %v907_v43  ;;  %v810_v48 = vmax.f32 %v808_v30, %v809_v41  ;;  %v926_v2 = vpack.c.bf16 %v896_v15, %v896_v15  ;;  %v897_v17 = vmax.f32 %v873_v55, 0.0  ;;  %v2249_v30 = vpop.f32.mrf.mxu3 }
  0xf5   :  { %v482_v59 = vpop.f32.mrf.mxu0  ;;  %v733_v33 = vmax.f32 %v731_v12, %v732_v26  ;;  %v656_v19 = vrot.slane %v655_v47, 4  ;;  %v1014_v27 = vrot.slane %v972_v4, 7  ;;  %v973_v28 = vunpack.c.l.b16 %v924_v5 }
  0xf6   :  { %v979_v0 = vrot.slane %v956_v54, 7  ;;  %v2220_v37 = vpop.f32.mrf.mxu1  ;;  %v593_v21 = vsel %vm2045_vm10, %v482_v59, -1e+30  ;;  %v841_v54 = vmax.f32 %v839_v14, %v840_v34  ;;  %v811_v56 = vrot.slane %v810_v48, 2 }
  0xf7   :  { %v862_v43 = vadd.f32 %v2172_v50, %v733_v33  ;;  %v662_v58 = vsel %vm178_vm12, %v593_v21, -inf  ;;  %v922_v59 = vpack.c.bf16 %v892_v42, %v892_v42  ;;  %v975_v25 = vunpack.c.l.b16 %v926_v2 }
  0xf8   :  { %v2199_v9 = vsel %vm980_vm13, %v979_v0, %v955_v61  ;;  %v693_v0 = vmax.f32 %v2071_v35, %v692_v38  ;;  %v812_v3 = vmax.f32 %v810_v48, %v811_v56  ;;  %v874_v7 = vadd.f32 %v2172_v50, %v841_v54 }
  0xf9   :  { %v886_v53 = vmax.f32 %v862_v43, 0.0  ;;  %v618_v35 = vsel %vm2054_vm11, %v2076_v39, -1e+30  ;;  %v971_v23 = vunpack.c.l.b16 %v922_v59  ;;  %v1724_v39 = vld [vmem:[%s2420_s7 + $0x8] sm:$0xff]  ;;  %v770_v34 = vsel %vm178_vm12, %v617_v10, -inf }
  0xfa   :  { %v813_v12 = vrot.slane %v812_v3, 1  ;;  %v694_v20 = vrot.slane %v693_v0, 2  ;;  %v898_v24 = vmax.f32 %v874_v7, 0.0  ;;  %v927_v38 = vpack.c.bf16 %v897_v17, %v897_v17  ;;  %1060 = vmatpush.bf16.msrb.mxu2 %v1724_v39 }
  0xfb   :  { %v916_v57 = vpack.c.bf16 %v886_v53, %v886_v53  ;;  %v701_v41 = vrot.slane %v2103_v63, 4  ;;  %v1020_v42 = vrot.slane %v975_v25, 4  ;;  %v1015_v46 = vsel %vm980_vm13, %v1014_v27, %v971_v23 }
  0xfc   :  { %v814_v26 = vmax.f32 %v812_v3, %v813_v12  ;;  %v2259_v40 = vmax.f32 %v693_v0, %v694_v20  ;;  %v1016_v43 = vrot.slane %v973_v28, 6  ;;  %v928_v45 = vpack.c.bf16 %v898_v24, %v898_v24 }
  0xfd   :  { %v484_v36 = vpop.f32.mrf.mxu0  ;;  %v965_v6 = vunpack.c.l.b16 %v916_v57  ;;  %v610_v53 = vsel %vm2054_vm11, %v2220_v37, -1e+30  ;;  %v976_v55 = vunpack.c.l.b16 %v927_v38  ;;  %v2276_v37 = vpop.f32.mrf.mxu3  ;;  %v702_v7 = vmax.f32 %v2103_v63, %v701_v41 }
  0xfe   :  { %v594_v49 = vsel %vm2054_vm11, %v484_v36, -1e+30  ;;  %v2237_v8 = vpop.f32.mrf.mxu1  ;;  %v871_v31 = vadd.f32 %v2172_v50, %v814_v26  ;;  %v771_v36 = vsel %vm178_vm12, %v618_v35, -inf  ;;  %v735_v59 = vsel %vm178_vm12, %v610_v53, -inf }
  0xff   :  { %v663_v61 = vsel %vm178_vm12, %v594_v49, -inf  ;;  %v1002_v13 = vrot.slane %v965_v6, 6  ;;  %v977_v2 = vunpack.c.l.b16 %v928_v45  ;;  %v1017_v3 = vsel %vm983_vm14, %v1016_v43, %v1015_v46 }
 0x100   :  { %v664_v14 = vmax.f32 %v662_v58, %v663_v61  ;;  %v895_v15 = vmax.f32 %v871_v31, 0.0  ;;  %v772_v28 = vmax.f32 %v770_v34, %v771_v36  ;;  %v696_v39 = vrot.slane %v2259_v40, 1 }
 0x101   :  { %v2247_v29 = vsel %vm983_vm14, %v1002_v13, %v2202_v11  ;;  %v657_v11 = vmax.f32 %v655_v47, %v656_v19  ;;  %v609_v47 = vsel %vm2045_vm10, %v2193_v60, -1e+30  ;;  %v611_v60 = vsel %vm2045_vm10, %v2237_v8, -1e+30 }
 0x102   :  { %v665_v32 = vrot.slane %v664_v14, 4  ;;  %v925_v51 = vpack.c.bf16 %v895_v15, %v895_v15  ;;  %v743_v13 = vsel %vm178_vm12, %v611_v60, -inf  ;;  %v1024_v25 = vrot.slane %v977_v2, 2 }
 0x103   :  { %v658_v56 = vrot.slane %v657_v11, 2  ;;  %v703_v31 = vrot.slane %v702_v7, 2  ;;  %v773_v43 = vrot.slane %v772_v28, 4  ;;  %v697_v36 = vmax.f32 %v2259_v40, %v696_v39 }
 0x104   :  { %v666_v52 = vmax.f32 %v664_v14, %v665_v32  ;;  %v974_v58 = vunpack.c.l.b16 %v925_v51  ;;  %v734_v14 = vsel %vm178_vm12, %v609_v47, -inf }
 0x105   :  { %v487_v16 = vpop.f32.mrf.mxu0  ;;  %v659_v10 = vmax.f32 %v657_v11, %v658_v56  ;;  %v736_v19 = vmax.f32 %v734_v14, %v735_v59  ;;  %v2290_v11 = vpop.f32.mrf.mxu3  ;;  %v704_v45 = vmax.f32 %v702_v7, %v703_v31  ;;  %v1723_v31 = vld [vmem:[%s2420_s7] sm:$0xff] }
 0x106   :  { %v595_v33 = vsel %vm2045_vm10, %v487_v16, -1e+30  ;;  %v529_v49 = vpop.f32.mrf.mxu1  ;;  %v1018_v4 = vrot.slane %v974_v58, 5  ;;  %v667_v5 = vrot.slane %v666_v52, 2  ;;  %v1022_v16 = vrot.slane %v976_v55, 3  ;;  %1061 = vmatpush.bf16.msrb.mxu2 %v1723_v31 }
 0x107   :  { %v671_v21 = vsel %vm178_vm12, %v595_v33, -inf  ;;  %v612_v0 = vsel %vm2054_vm11, %v529_v49, -1e+30  ;;  %v660_v33 = vrot.slane %v659_v10, 1  ;;  %v737_v38 = vrot.slane %v736_v19, 4 }
 0x108   :  { %v744_v12 = vsel %vm178_vm12, %v612_v0, -inf  ;;  %v1019_v17 = vsel %vm986_vm15, %v1018_v4, %v1017_v3  ;;  %v668_v26 = vmax.f32 %v666_v52, %v667_v5  ;;  %v634_v52 = vsel %vm2054_vm11, %v2249_v30, -1e+30 }
 0x109   :  { %v1021_v8 = vsel %vm989_vm1, %v1020_v42, %v1019_v17  ;;  %v745_v27 = vmax.f32 %v743_v13, %v744_v12  ;;  %v661_v49 = vmax.f32 %v659_v10, %v660_v33  ;;  %v738_v51 = vmax.f32 %v736_v19, %v737_v38 }
 0x10a   :  { %v1023_v24 = vsel %vm992_vm3, %v1022_v16, %v1021_v8  ;;  %v669_v42 = vrot.slane %v668_v26, 1  ;;  %v774_v30 = vmax.f32 %v772_v28, %v773_v43  ;;  %v705_v59 = vrot.slane %v704_v45, 1 }
 0x10b   :  { %v2293_v41 = vsel %vm995_vm4, %v1024_v25, %v1023_v24  ;;  %v746_v15 = vrot.slane %v745_v27, 4  ;;  %v854_v4 = vadd.f32 %v2172_v50, %v661_v49  ;;  %v739_v60 = vrot.slane %v738_v51, 2 }
 0x10c   :  { %v670_v56 = vmax.f32 %v668_v26, %v669_v42  ;;  %v858_v17 = vadd.f32 %v2172_v50, %v697_v36  ;;  %v706_v19 = vmax.f32 %v704_v45, %v705_v59 }
 0x10d   :  { %v489_v48 = vpop.f32.mrf.mxu0  ;;  %v747_v40 = vmax.f32 %v745_v27, %v746_v15  ;;  %v2317_v7 = vpop.f32.mrf.mxu3  ;;  %v878_v8 = vmax.f32 %v854_v4, 0.0  ;;  %v740_v25 = vmax.f32 %v738_v51, %v739_v60 }
 0x10e   :  { %v596_v54 = vsel %vm2054_vm11, %v489_v48, -1e+30  ;;  %v532_v23 = vpop.f32.mrf.mxu1  ;;  %v855_v16 = vadd.f32 %v2172_v50, %v670_v56  ;;  %v882_v33 = vmax.f32 %v858_v17, 0.0  ;;  %v859_v38 = vadd.f32 %v2172_v50, %v706_v19 }
 0x10f   :  { %v672_v57 = vsel %vm178_vm12, %v596_v54, -inf  ;;  %v613_v48 = vsel %vm2045_vm10, %v532_v23, -1e+30  ;;  %v748_v10 = vrot.slane %v747_v40, 2  ;;  %v775_v23 = vrot.slane %v774_v30, 2 }
 0x110   :  { %v673_v61 = vmax.f32 %v671_v21, %v672_v57  ;;  %v633_v21 = vsel %vm2045_vm10, %v2225_v44, -1e+30  ;;  %v752_v58 = vsel %vm178_vm12, %v613_v48, -inf  ;;  %v879_v27 = vmax.f32 %v855_v16, 0.0 }
 0x111   :  { %v842_v5 = vsel %vm178_vm12, %v633_v21, -inf  ;;  %v749_v28 = vmax.f32 %v747_v40, %v748_v10  ;;  %v908_v43 = vpack.c.bf16 %v878_v8, %v878_v8 }
 0x112   :  { %v674_v6 = vrot.slane %v673_v61, 4  ;;  %v909_v21 = vpack.c.bf16 %v879_v27, %v879_v27 }
 0x113   :  { %v750_v48 = vrot.slane %v749_v28, 1 }
 0x114   :  { %v675_v35 = vmax.f32 %v673_v61, %v674_v6  ;;  %v843_v6 = vsel %vm178_vm12, %v634_v52, -inf }
 0x115   :  { %v492_v20 = vpop.f32.mrf.mxu0  ;;  %v844_v26 = vmax.f32 %v842_v5, %v843_v6  ;;  %v1115_v45 = vpop.f32.mrf.mxu3 }
 0x116   :  { %v676_v63 = vrot.slane %v675_v35, 2  ;;  %v597_v46 = vsel %vm2045_vm10, %v492_v20, -1e+30  ;;  %v534_v55 = vpop.f32.mrf.mxu1 }
 0x117   :  { %v680_v53 = vsel %vm178_vm12, %v597_v46, -inf  ;;  %v614_v44 = vsel %vm2054_vm11, %v534_v55, -1e+30  ;;  %v776_v46 = vmax.f32 %v774_v30, %v775_v23  ;;  %v845_v36 = vrot.slane %v844_v26, 4 }
 0x118   :  { %v677_v32 = vmax.f32 %v675_v35, %v676_v63  ;;  %v753_v0 = vsel %vm178_vm12, %v614_v44, -inf }
 0x119   :  { %v754_v3 = vmax.f32 %v752_v58, %v753_v0  ;;  %v777_v40 = vrot.slane %v776_v46, 1  ;;  %v751_v0 = vmax.f32 %v749_v28, %v750_v48 }
 0x11a   :  { %v678_v34 = vrot.slane %v677_v32, 1 }
 0x11b   :  { %v755_v14 = vrot.slane %v754_v3, 4  ;;  %v864_v17 = vadd.f32 %v2172_v50, %v751_v0 }
 0x11c   :  { %v679_v57 = vmax.f32 %v677_v32, %v678_v34  ;;  %v741_v34 = vrot.slane %v740_v25, 1 }
 0x11d   :  { %v494_v54 = vpop.f32.mrf.mxu0  ;;  %v756_v20 = vmax.f32 %v754_v3, %v755_v14  ;;  %v2334_v14 = vpop.f32.mrf.mxu3  ;;  %v888_v31 = vmax.f32 %v864_v17, 0.0 }
 0x11e   :  { %v598_v47 = vsel %vm2054_vm11, %v494_v54, -1e+30  ;;  %v856_v35 = vadd.f32 %v2172_v50, %v679_v57  ;;  %v537_v63 = vpop.f32.mrf.mxu1  ;;  %v883_v54 = vmax.f32 %v859_v38, 0.0  ;;  %v742_v44 = vmax.f32 %v740_v25, %v741_v34 }
 0x11f   :  { %v681_v61 = vsel %vm178_vm12, %v598_v47, -inf  ;;  %v757_v39 = vrot.slane %v756_v20, 2  ;;  %v615_v56 = vsel %vm2045_vm10, %v537_v63, -1e+30  ;;  %v957_v47 = vunpack.c.l.b16 %v908_v43 }
 0x120   :  { %v682_v2 = vmax.f32 %v680_v53, %v681_v61  ;;  %v880_v32 = vmax.f32 %v856_v35, 0.0  ;;  %v912_v53 = vpack.c.bf16 %v882_v33, %v882_v33  ;;  %v846_v57 = vmax.f32 %v844_v26, %v845_v36 }
 0x121   :  { %v758_v15 = vmax.f32 %v756_v20, %v757_v39  ;;  %v958_v61 = vunpack.c.l.b16 %v909_v21  ;;  %v761_v4 = vsel %vm178_vm12, %v615_v56, -inf  ;;  %v913_v18 = vpack.c.bf16 %v883_v54, %v883_v54 }
 0x122   :  { %v683_v12 = vrot.slane %v682_v2, 4  ;;  %v910_v51 = vpack.c.bf16 %v880_v32, %v880_v32  ;;  %v961_v16 = vunpack.c.l.b16 %v912_v53  ;;  %v982_v10 = vrot.slane %v957_v47, 6 }
 0x123   :  { %v759_v52 = vrot.slane %v758_v15, 1  ;;  %v985_v35 = vrot.slane %v958_v61, 5  ;;  %v847_v20 = vrot.slane %v846_v57, 2  ;;  %v962_v25 = vunpack.c.l.b16 %v913_v18 }
 0x124   :  { %v684_v13 = vmax.f32 %v682_v2, %v683_v12  ;;  %v959_v2 = vunpack.c.l.b16 %v910_v51  ;;  %v863_v12 = vadd.f32 %v2172_v50, %v742_v44  ;;  %v994_v27 = vrot.slane %v961_v16, 2 }
 0x125   :  { %v760_v3 = vmax.f32 %v758_v15, %v759_v52  ;;  %v984_v28 = vsel %vm983_vm14, %v982_v10, %v2199_v9  ;;  %v997_v43 = vrot.slane %v962_v25, 1  ;;  %v1193_v9 = vpop.f32.mrf.mxu3  ;;  %v918_v48 = vpack.c.bf16 %v888_v31, %v888_v31 }
 0x126   :  { %v685_v24 = vrot.slane %v684_v13, 2  ;;  %v539_v58 = vpop.f32.mrf.mxu1  ;;  %v988_v23 = vrot.slane %v959_v2, 4  ;;  %v987_v39 = vsel %vm986_vm15, %v985_v35, %v984_v28  ;;  %v1730_v2 = vld [vmem:[%s2421_s9 + $0x10] sm:$0xff] }
 0x127   :  { %v616_v59 = vsel %vm2054_vm11, %v539_v58, -1e+30  ;;  %v865_v8 = vadd.f32 %v2172_v50, %v760_v3  ;;  %1237 = vmatpush.bf16.msra.mxu2 %v1730_v2 }
 0x128   :  { %v686_v42 = vmax.f32 %v684_v13, %v685_v24  ;;  %v762_v5 = vsel %vm178_vm12, %v616_v59, -inf  ;;  %v778_v13 = vmax.f32 %v776_v46, %v777_v40  ;;  %v887_v24 = vmax.f32 %v863_v12, 0.0 }
 0x129   :  { %v763_v6 = vmax.f32 %v761_v4, %v762_v5  ;;  %v889_v15 = vmax.f32 %v865_v8, 0.0  ;;  %v990_v46 = vsel %vm989_vm1, %v988_v23, %v987_v39  ;;  %v967_v40 = vunpack.c.l.b16 %v918_v48 }
 0x12a   :  { %v687_v49 = vrot.slane %v686_v42, 1  ;;  %v867_v38 = vadd.f32 %v2172_v50, %v778_v13  ;;  %v917_v45 = vpack.c.bf16 %v887_v24, %v887_v24  ;;  %v1079_v24 = vperm.slane %v2101_v62, 3 }
 0x12b   :  { %v764_v19 = vrot.slane %v763_v6, 4  ;;  %v919_v54 = vpack.c.bf16 %v889_v15, %v889_v15  ;;  %v930_v39 = vperm.slane %v2101_v62, 2 }
 0x12c   :  { %v688_v55 = vmax.f32 %v686_v42, %v687_v49  ;;  %v848_v42 = vmax.f32 %v846_v57, %v847_v20  ;;  %v891_v52 = vmax.f32 %v867_v38, 0.0  ;;  %v966_v56 = vunpack.c.l.b16 %v917_v45 }
 0x12d   :  { %v765_v63 = vmax.f32 %v763_v6, %v764_v19  ;;  %v968_v58 = vunpack.c.l.b16 %v919_v54  ;;  %v1728_v19 = vld [vmem:[%s2421_s9] sm:$0xff]  ;;  %v1114_v31 = vadd.f32 %v2317_v7, %v1079_v24  ;;  %v1109_v15 = vadd.f32 %v2276_v37, %v1079_v24 }
 0x12e   :  { %v857_v30 = vadd.f32 %v2172_v50, %v688_v55  ;;  %v849_v53 = vrot.slane %v848_v42, 1  ;;  %v921_v44 = vpack.c.bf16 %v891_v52, %v891_v52  ;;  %v1004_v0 = vrot.slane %v966_v56, 5  ;;  %v1735_v37 = vld [vmem:[%s2422_s12] sm:$0xff] }
 0x12f   :  { %v766_v33 = vrot.slane %v765_v63, 2  ;;  %v1008_v5 = vrot.slane %v968_v58, 3  ;;  %1767 = vtanh.f32 %v1114_v31  ;;  %v1793_v52 = vld [vmem:[%s2414_s15] sm:$0xff] }
 0x130   :  { %v881_v60 = vmax.f32 %v857_v30, 0.0  ;;  %v850_v57 = vmax.f32 %v848_v42, %v849_v53  ;;  %v1006_v30 = vrot.slane %v967_v40, 4  ;;  %v970_v3 = vunpack.c.l.b16 %v921_v44 }
 0x131   :  { %v767_v34 = vmax.f32 %v765_v63, %v766_v33  ;;  %v1005_v6 = vsel %vm986_vm15, %v1004_v0, %v2247_v29  ;;  %v1251_v53 = vperm.slane %v1793_v52, 5 }
 0x132   :  { %v911_v22 = vpack.c.bf16 %v881_v60, %v881_v60  ;;  %v875_v4 = vadd.f32 %v2172_v50, %v850_v57  ;;  %v1729_v60 = vld [vmem:[%s2421_s9 + $0x8] sm:$0xff]  ;;  %v1007_v10 = vsel %vm989_vm1, %v1006_v30, %v1005_v6  ;;  %v1012_v12 = vrot.slane %v970_v3, 1 }
 0x133   :  { %v768_v49 = vrot.slane %v767_v34, 1  ;;  %v1009_v35 = vsel %vm992_vm3, %v1008_v5, %v1007_v10  ;;  %1238 = vmatpush.bf16.msra.mxu2 %v1729_v60  ;;  %v1203_v30 = vperm.slane %v1793_v52, 4  ;;  %v1386_v5 = vld [vmem:[%s2424_s14 + $0x8] sm:$0xf] }
 0x134   :  { %v960_v26 = vunpack.c.l.b16 %v911_v22  ;;  %v899_v17 = vmax.f32 %v875_v4, 0.0 }
 0x135   :  { %v769_v55 = vmax.f32 %v767_v34, %v768_v49  ;;  %v1320_v49 = vld [vmem:[%s2423_s11 + $0x8] sm:$0xf] }
 0x136   :  { %v991_v32 = vrot.slane %v960_v26, 3  ;;  %v929_v20 = vpack.c.bf16 %v899_v17, %v899_v17  ;;  %v1359_v56 = vunpack.c.l.b16 %v1320_v49 }
 0x137   :  { %v866_v47 = vadd.f32 %v2172_v50, %v769_v55  ;;  %1239 = vmatpush.bf16.msra.mxu2 %v1728_v19 }
 0x138   :  { %v993_v36 = vsel %vm992_vm3, %v991_v32, %v990_v46  ;;  %v978_v29 = vunpack.c.l.b16 %v929_v20  ;;  %v1768_v46 = vpop.eup %1767  ;;  %v1361_v44 = vpack.c.b16 %v1359_v56, %v1359_v56 }
 0x139   :  { %v996_v21 = vsel %vm995_vm4, %v994_v27, %v993_v36  ;;  %v890_v61 = vmax.f32 %v866_v47, 0.0 }
 0x13a   :  { %v999_v51 = vsel %vm998_vm5, %v997_v43, %v996_v21  ;;  %v1026_v23 = vrot.slane %v978_v29, 1 }
 0x13b   :  { %v920_v59 = vpack.c.bf16 %v890_v61, %v890_v61  ;;  %v1367_v61 = vsel %vm1095_vm0, %v1361_v44, 0 }
 0x13c   :  { %v1027_v8 = vsel %vm998_vm5, %v1026_v23, %v2293_v41  ;;  %v1111_v41 = vadd.f32 %v2290_v11, %v1079_v24 }
 0x13d   :  { %v969_v18 = vunpack.c.l.b16 %v920_v59  ;;  %v1029_v25 = vpack.c.b16 %v1027_v8, %v1027_v8  ;;  %v1734_v59 = vld [vmem:[%s2423_s11] sm:$0xff] }
 0x13f   :  { %v1010_v16 = vrot.slane %v969_v18, 2  ;;  %v1394_v18 = vunpack.c.l.b16 %v1386_v5 }
 0x141   :  { %v1011_v22 = vsel %vm995_vm4, %v1010_v16, %v1009_v35  ;;  %v1396_v60 = vpack.c.b16 %v1394_v18, %v1394_v18 }
 0x142   :  { %v1013_v50 = vsel %vm998_vm5, %v1012_v12, %v1011_v22  ;;  %v1736_v22 = vld [vmem:[%s2424_s14] sm:$0xff] }
 0x143   :  { %v1028_v13 = vpack.c.b16 %v1013_v50, %v999_v51  ;;  %v1402_v6 = vsel %vm1095_vm0, %v1396_v60, 0  ;;  %v1174_v50 = vrot.slane %v1793_v52, 6 }
 0x144   :  { %1410 = vmatpush.bf16.msra.mxu3 %v1402_v6 }
 0x145   :  { %1622 = vmatmul.msk.bf16.vlgmr.msrb.gmra.mxu2 %vm178_vm12, %v1028_v13  ;;  %v1192_v19 = vadd.f32 %v2334_v14, %v1174_v50 }
 0x147   :  { %v1382_v20 = vperm.slane %v1192_v19, 0 }
 0x148   :  { %1411 = vmatpush.bf16.msra.mxu3 %v1736_v22 }
 0x155   :  { %1623 = vmatmul.msk.bf16.gmra.mxu2 %vm178_vm12, %v1029_v25 }
 0x15e   :  { %v1279_v26 = vpop.f32.mrf.mxu3 }
 0x15f   :  { %v1280_v47 = vadd.f32 %v1279_v26, %v1251_v53  ;;  %v1388_v26 = vperm.slane %v1793_v52, 7 }
 0x165   :  { %1647 = vmatmul.msk.bf16.vlgmr.msra.gmra.mxu2 %vm178_vm12, %v2144_v1  ;;  %v1324_v1 = vld [vmem:[%s2422_s12 + $0x8] sm:$0xf] }
 0x166   :  { %v1281_v63 = vpop.f32.mrf.mxu3  ;;  %v1331_v62 = vunpack.c.l.b16 %v1324_v1 }
 0x168   :  { %v1333_v11 = vpack.c.b16 %v1331_v62, %v1331_v62 }
 0x16a   :  { %v1339_v21 = vsel %vm1095_vm0, %v1333_v11, 0 }
 0x16b   :  { %1347 = vmatpush.bf16.msra.mxu0 %v1339_v21 }
 0x16f   :  { %1348 = vmatpush.bf16.msra.mxu0 %v1735_v37 }
 0x1c8   :  { %v1063_v27 = vpop.f32.mrf.mxu2 }
 0x1c9   :  { %v1064_v42 = vadd.f32 %v1063_v27, %v930_v39 }
 0x1d0   :  { %v1065_v28 = vpop.f32.mrf.mxu2 }
 0x1d1   :  { %v1066_v32 = vadd.f32 %v1065_v28, %v930_v39 }
 0x1d3   :  { %1769 = vtanh.f32 %v1066_v32 }
 0x1d8   :  { %v1068_v33 = vpop.f32.mrf.mxu2 }
 0x1d9   :  { %v1069_v38 = vadd.f32 %v1068_v33, %v930_v39  ;;  %v1770_v7 = vpop.eup %1769 }
 0x1db   :  { %1771 = vtanh.f32 %v1069_v38 }
 0x1dc   :  { %1773 = vtanh.f32 %v1111_v41 }
 0x1dd   :  { %1775 = vtanh.f32 %v1064_v42 }
 0x1de   :  { %1777 = vtanh.f32 %v1109_v15 }
 0x1e0   :  { %v1070_v43 = vpop.f32.mrf.mxu2 }
 0x1e1   :  { %v1772_v34 = vpop.eup %1771 }
 0x1e2   :  { %v1122_v36 = vadd.f32 %v1772_v34, %v1768_v46  ;;  %v1774_v45 = vpop.eup %1773 }
 0x1e3   :  { %v1121_v9 = vadd.f32 %v1774_v45, %v1770_v7  ;;  %v1776_v48 = vpop.eup %1775 }
 0x1e4   :  { %1779 = vtanh.f32 %v1122_v36  ;;  %v1778_v51 = vpop.eup %1777 }
 0x1e5   :  { %v1120_v54 = vadd.f32 %v1778_v51, %v1776_v48  ;;  %1781 = vtanh.f32 %v1121_v9 }
 0x1e7   :  { %1783 = vtanh.f32 %v1120_v54 }
 0x1e8   :  { %v1241_v55 = vpop.f32.mrf.mxu2  ;;  %1785 = vtanh.f32 %v1280_v47 }
 0x1e9   :  { %v1242_v3 = vadd.f32 %v1241_v55, %v1203_v30 }
 0x1ea   :  { %v1780_v40 = vpop.eup %1779 }
 0x1eb   :  { %1661 = vmatpush.xpose.msk.msrb.mxu2 %vm1284_vm6, %v1780_v40  ;;  %v1782_v57 = vpop.eup %1781  ;;  %v1321_v4 = vpack.c.bf16 %v1242_v3, %v1242_v3 }
 0x1ed   :  { %v1784_v0 = vpop.eup %1783 }
 0x1ee   :  { %v1786_v2 = vpop.eup %1785 }
 0x1ef   :  { %1662 = vmatpush.xpose.msk.msrb.mxu2 %vm1284_vm6, %v1782_v57 }
 0x1f0   :  { %v1243_v58 = vpop.f32.mrf.mxu2 }
 0x1f3   :  { %1663 = vmatpush.xpose.msk.msrb.mxu2 %vm1284_vm6, %v1784_v0 }
 0x1f6   :  { %1664 = vmatmul.msk.f32.vlgmr.msrb.gmra.mxu2 %vm1284_vm6, %v1786_v2 }
 0x1f7   :  { %1375 = vmatpush.bf16.msra.mxu2 %v1367_v61 }
 0x1fb   :  { %1376 = vmatpush.bf16.msra.mxu2 %v1734_v59 }
 0x1fe   :  { %1674 = vmatmul.msk.bf16.vlgmr.msra.gmra.mxu2 %vm1142_vm2, %v1321_v4 }
 0x279   :  { %v1314_v16 = vpop.f32.mrf.mxu2 }
 0x27a   :  { %1787 = vtanh.f32 %v1314_v16 }
 0x280   :  { %v1788_v10 = vpop.eup %1787 }
 0x281   :  { %v1325_v12 = vpack.c.bf16 %v1788_v10, %v1788_v10  ;;  %v1378_v35 = vpop.f32.mrf.mxu2 }
 0x283   :  { %1669 = vmatmul.msk.bf16.vlgmr.msra.gmra.mxu0 %vm1142_vm2, %v1325_v12 }
 0x289   :  { %v1380_v17 = vpop.f32.mrf.mxu2 }
 0x300   :  { %v1350_v13 = vpop.f32.mrf.mxu0 }
 0x301   :  { %v1379_v29 = vadd.f32 %v1378_v35, %v1350_v13 }
 0x303   :  { %v1383_v23 = vadd.f32 %v1382_v20, %v1379_v29 }
 0x305   :  { %v1387_v8 = vpack.c.bf16 %v1383_v23, %v1383_v23 }
 0x307   :  { %1679 = vmatmul.msk.bf16.vlgmr.msra.gmra.mxu3 %vm1142_vm2, %v1387_v8 }
 0x308   :  { %v1352_v25 = vpop.f32.mrf.mxu0 }
 0x38a   :  { %v1413_v63 = vpop.f32.mrf.mxu3 }
 0x38b   :  { %v1414_v27 = vadd.f32 %v1413_v63, %v1388_v26 }
 0x38d   :  { %v1680_v28 = vmul.f32 -1.442695, %v1414_v27 }
 0x38f   :  { %1789 = vpow2.f32 %v1680_v28 }
 0x392   :  { %v1415_v24 = vpop.f32.mrf.mxu3 }
 0x395   :  { %v1790_v39 = vpop.eup %1789 }
 0x396   :  { %v1420_v31 = vadd.f32 1.0, %v1790_v39 }
 0x398   :  { %1791 = vrcp.f32 %v1420_v31  ;;  %v1432_v41 = vand.u32 2147483648, %v1420_v31  ;;  %v1430_v42 = vand.u32 2147483647, %v1420_v31  ;;  %vm1426_vm7 = vweird.f32 %v1420_v31 }
 0x39a   :  { %v1433_v1 = vor.u32 1.1754944e-38, %v1432_v41  ;;  %vm1431_vm9 = vcmp.eq.f32.partialorder %v1430_v42, 8.507059e+37 }
 0x39e   :  { %v1792_v32 = vpop.eup %1791 }
 0x39f   :  { %v1422_v33 = vmul.f32 %v1792_v32, %v1420_v31  ;;  %vm1427_vm0 = vweird.f32 %v1792_v32 }
 0x3a0   :  { %vm1428_vm2 = vmor %vm1426_vm7, %vm1427_vm0 }
 0x3a1   :  { %v1423_v14 = vsub.f32 1.0, %v1422_v33 }
 0x3a3   :  { %v1424_v38 = vmul.f32 %v1792_v32, %v1423_v14 }
 0x3a5   :  { %v1425_v15 = vadd.f32 %v1792_v32, %v1424_v38 }
 0x3a7   :  { %v1429_v46 = vsel %vm1428_vm2, %v1792_v32, %v1425_v15 }
 0x3a8   :  { %v1434_v62 = vsel %vm1431_vm9, %v1433_v1, %v1429_v46 }
 0x3a9   :  { %1437 = vst.msk [vmem:[%s2425_s16] sm:$0x3] %vm1436_vm8, %v1434_v62 }

</bundles_post_ra>
